<compile_context>
chip_gen: v7x
topology: tpu7x:2x2x1
jax: 0.10.0
libtpu: 0.0.40
codegen_flags: <defaults>
</compile_context>

<pallas_src>
import math

import jax
import jax.numpy as jnp
from jax import lax
from jax.experimental import pallas as pl
from jax.experimental.pallas import tpu as pltpu


# ----------------------------------------------------------------------------
# Small helpers (plain JAX / python, run once per call outside the kernels)
# ----------------------------------------------------------------------------
def _round_up(x, m):
    return ((x + m - 1) // m) * m


def _nbytes(shape, dtype):
    return math.prod(shape) * jnp.dtype(dtype).itemsize


def _vmem_limit(block_bytes, tmp_bytes):
    # Double-buffered pipeline blocks + compiler temporaries + headroom,
    # floored at 32 MiB and capped at 48 MiB so the request stays inside the
    # physical VMEM of every generation (v7x TensorCore = 64 MiB).
    est = 2 * block_bytes + 2 * tmp_bytes + (16 << 20)
    return int(min(max(est, 32 << 20), 48 << 20))


def _pad_channels(x, target):
    c = x.shape[-1]
    if c == target:
        return x
    widths = [(0, 0)] * (x.ndim - 1) + [(0, target - c)]
    return jnp.pad(x, widths)


def _bn_scale_shift(gamma, beta, mean, var, cpad, eps=1e-5):
    scale = gamma / jnp.sqrt(var + eps)
    shift = beta - mean * scale
    scale = _pad_channels(scale.reshape(1, -1).astype(jnp.float32), cpad)
    shift = _pad_channels(shift.reshape(1, -1).astype(jnp.float32), cpad)
    return scale, shift


def _prep_conv3x3_w(w_oihw, cin_p, cout_p, dot_dtype):
    # (Cout, Cin, 3, 3) -> (3, 3, Cin, Cout) -> (9*Cin_pad, Cout_pad); row order is
    # tap-major (t = dh*3 + dw) then Cin, matching the in-kernel im2col strip.
    cout, cin = w_oihw.shape[0], w_oihw.shape[1]
    w = jnp.transpose(w_oihw, (2, 3, 1, 0)).reshape(9, cin, cout)
    w = jnp.pad(w, ((0, 0), (0, cin_p - cin), (0, cout_p - cout)))
    return w.reshape(9 * cin_p, cout_p).astype(dot_dtype)


def _prep_conv1x1_w(w_oihw, cin_p, cout_p, dot_dtype):
    cout, cin = w_oihw.shape[0], w_oihw.shape[1]
    w = w_oihw.reshape(cout, cin).T
    w = jnp.pad(w, ((0, cin_p - cin), (0, cout_p - cout)))
    return w.astype(dot_dtype)


# ----------------------------------------------------------------------------
# Fused BN + ReLU + 3x3 conv (+ optional fused residual / 1x1 shortcut) kernel
# ----------------------------------------------------------------------------
def _make_fused_conv_kernel(H, W, cin, cout, mode, dot_dtype):
    """mode: "none" | "identity" | "conv" (1x1 shortcut conv + bias + add)."""

    def kernel(*refs):
        if mode == "conv":
            (x_ref, scale_ref, shift_ref, w_ref, b_ref,
             r_ref, ws_ref, bs_ref, o_ref) = refs
        elif mode == "identity":
            x_ref, scale_ref, shift_ref, w_ref, b_ref, r_ref, o_ref = refs
        else:
            x_ref, scale_ref, shift_ref, w_ref, b_ref, o_ref = refs

        # Fused inference-BatchNorm + ReLU (f32 on the VPU).
        x = x_ref[0].astype(jnp.float32)                      # (H+2, W+2, cin)
        a = jnp.maximum(x * scale_ref[...] + shift_ref[...], 0.0)

        # The conv pads *after* the activation, so the spatial halo must be zero
        # post-BN/ReLU (the pre-padded zeros would otherwise pick up the BN shift).
        hi = lax.broadcasted_iota(jnp.int32, (H + 2, W + 2, 1), 0)
        wi = lax.broadcasted_iota(jnp.int32, (H + 2, W + 2, 1), 1)
        interior = (hi >= 1) & (hi <= H) & (wi >= 1) & (wi <= W)
        a = jnp.where(interior, a, 0.0)                       # f32 (H+2, W+2, cin)

        # Cast to the MXU dtype once per dw-column (3 casts instead of 9 per-tap
        # casts); the sublane-offset slicing happens while still f32.
        cols = [a[:, dw:dw + W, :].astype(dot_dtype) for dw in range(3)]

        # im2col strip: lane-aligned concat of the 9 taps -> ONE MXU matmul with
        # K = 9*cin (instead of 9 accumulated K=cin matmuls + 8 VPU add passes).
        taps = [cols[dw][dh:dh + H].reshape(H * W, cin)
                for dh in range(3) for dw in range(3)]        # t = dh*3 + dw order
        strip = jnp.concatenate(taps, axis=-1)                # (H*W, 9*cin)

        acc = jnp.dot(strip, w_ref[...], preferred_element_type=jnp.float32)
        acc = acc + b_ref[...]

        # Fused residual path.
        if mode == "identity":
            acc = acc + r_ref[0].reshape(H * W, cout).astype(jnp.float32)
        elif mode == "conv":
            r = r_ref[0].reshape(H * W, r_ref.shape[-1]).astype(dot_dtype)
            acc = acc + jnp.dot(r, ws_ref[...], preferred_element_type=jnp.float32)
            acc = acc + bs_ref[...]

        o_ref[...] = acc.reshape(1, H, W, cout).astype(o_ref.dtype)

    return kernel


def fused_conv3x3(xp, scale, shift, w9, bias, *, out_dtype, dot_dtype,
                  residual=None, short_w=None, short_b=None):
    """xp: (N, H+2, W+2, Cin_pad) spatially pre-padded, channel-padded NHWC input."""
    n, hp, wp, cin = xp.shape
    H, W = hp - 2, wp - 2
    cout = w9.shape[-1]

    inputs = [xp, scale, shift, w9, bias]
    in_specs = [
        pl.BlockSpec((1, hp, wp, cin), lambda i: (i, 0, 0, 0)),
        pl.BlockSpec((1, cin), lambda i: (0, 0)),
        pl.BlockSpec((1, cin), lambda i: (0, 0)),
        pl.BlockSpec((9 * cin, cout), lambda i: (0, 0)),
        pl.BlockSpec((1, cout), lambda i: (0, 0)),
    ]
    block_bytes = (_nbytes((1, hp, wp, cin), xp.dtype)
                   + _nbytes((9 * cin, cout), w9.dtype)
                   + _nbytes((1, H, W, cout), out_dtype))

    if residual is None:
        mode = "none"
    elif short_w is None:
        mode = "identity"
        inputs += [residual]
        in_specs += [pl.BlockSpec((1, H, W, cout), lambda i: (i, 0, 0, 0))]
        block_bytes += _nbytes((1, H, W, cout), residual.dtype)
    else:
        mode = "conv"
        cres = residual.shape[-1]
        inputs += [residual, short_w, short_b]
        in_specs += [pl.BlockSpec((1, H, W, cres), lambda i: (i, 0, 0, 0)),
                     pl.BlockSpec((cres, cout), lambda i: (0, 0)),
                     pl.BlockSpec((1, cout), lambda i: (0, 0))]
        block_bytes += (_nbytes((1, H, W, cres), residual.dtype)
                        + _nbytes((cres, cout), short_w.dtype))

    # Compiler temporaries living in VMEM: post-BN activation, im2col strip, f32 acc.
    tmp_bytes = (_nbytes((hp, wp, cin), jnp.float32)
                 + _nbytes((H * W, 9 * cin), dot_dtype)
                 + _nbytes((H * W, cout), jnp.float32))

    kernel = _make_fused_conv_kernel(H, W, cin, cout, mode, dot_dtype)
    return pl.pallas_call(
        kernel,
        out_shape=jax.ShapeDtypeStruct((n, H, W, cout), out_dtype),
        grid=(n,),
        in_specs=in_specs,
        out_specs=pl.BlockSpec((1, H, W, cout), lambda i: (i, 0, 0, 0)),
        compiler_params=pltpu.CompilerParams(
            dimension_semantics=("parallel",),
            vmem_limit_bytes=_vmem_limit(block_bytes, tmp_bytes)),
    )(*inputs)


# ----------------------------------------------------------------------------
# Fused 1x1 shortcut conv + residual add (only used on the stride>1 path)
# ----------------------------------------------------------------------------
def _make_shortcut_add_kernel(dot_dtype):
    def kernel(x_ref, w_ref, b_ref, r_ref, o_ref):
        acc = jnp.dot(x_ref[...].astype(dot_dtype), w_ref[...],
                      preferred_element_type=jnp.float32)
        o_ref[...] = (acc + b_ref[...] + r_ref[...].astype(jnp.float32)
                      ).astype(o_ref.dtype)
    return kernel


def _pick_tile_m(m, k, n_out, budget_bytes=12 << 20):
    # Largest divisor of m (multiple of 8) whose double-buffered working set fits
    # the VMEM budget; falls back to a single block only for tiny m.
    for cand in (1024, 512, 256, 128, 64, 32, 16, 8):
        if m % cand:
            continue
        need = 4 * (2 * cand * k + 2 * k * n_out + 4 * cand * n_out)
        if need <= budget_bytes:
            return cand
    return m


def shortcut_matmul_add(x2d, w2d, bias_row, residual2d, *, dot_dtype):
    m, k = x2d.shape
    n_out = w2d.shape[1]
    tm = _pick_tile_m(m, k, n_out)
    block_bytes = (_nbytes((tm, k), x2d.dtype) + _nbytes((k, n_out), w2d.dtype)
                   + _nbytes((tm, n_out), residual2d.dtype) * 2)
    return pl.pallas_call(
        _make_shortcut_add_kernel(dot_dtype),
        out_shape=jax.ShapeDtypeStruct((m, n_out), residual2d.dtype),
        grid=(m // tm,),
        in_specs=[
            pl.BlockSpec((tm, k), lambda i: (i, 0)),
            pl.BlockSpec((k, n_out), lambda i: (0, 0)),
            pl.BlockSpec((1, n_out), lambda i: (0, 0)),
            pl.BlockSpec((tm, n_out), lambda i: (i, 0)),
        ],
        out_specs=pl.BlockSpec((tm, n_out), lambda i: (i, 0)),
        compiler_params=pltpu.CompilerParams(
            dimension_semantics=("parallel",),
            vmem_limit_bytes=_vmem_limit(block_bytes, _nbytes((tm, n_out), jnp.float32))),
    )(x2d, w2d, bias_row, residual2d)


# ----------------------------------------------------------------------------
# wide_basic forward (NCHW in / NCHW out, like the PyTorch module)
# ----------------------------------------------------------------------------
def wide_basic_forward(x_nchw, p, stride=1, dot_dtype=jnp.bfloat16):
    n, cin, h, w = x_nchw.shape
    planes = p["conv1_w"].shape[0]
    cin_p = _round_up(cin, 128)
    planes_p = _round_up(planes, 128)
    out_dtype = x_nchw.dtype

    # NCHW -> NHWC once per block; halo + channel pad fused into ONE XLA pad op.
    # TODO(synk): a full WRN should keep NHWC between blocks so this transpose
    # happens once per network, not per block.
    x = jnp.transpose(x_nchw, (0, 2, 3, 1))
    xc = _pad_channels(x, cin_p)                                   # residual input
    xp = jnp.pad(x, ((0, 0), (1, 1), (1, 1), (0, cin_p - cin)))    # conv1 input

    # ---- bn1 + relu + conv1 (one fused Pallas kernel) ----
    s1, t1 = _bn_scale_shift(p["bn1_gamma"], p["bn1_beta"],
                             p["bn1_mean"], p["bn1_var"], cin_p)
    w1 = _prep_conv3x3_w(p["conv1_w"], cin_p, planes_p, dot_dtype)
    b1 = _pad_channels(p["conv1_b"].astype(jnp.float32).reshape(1, -1), planes_p)
    # out1 is stored in the MXU dtype (bf16 on the production path): it is cast to
    # dot_dtype before conv2 anyway, and this halves the intermediate HBM traffic.
    out1 = fused_conv3x3(xp, s1, t1, w1, b1, out_dtype=dot_dtype, dot_dtype=dot_dtype)
    # TODO(synk): nn.Dropout implemented as the identity (inference mode).

    # ---- bn2 + relu + conv2 (+ fused shortcut / residual add) ----
    s2, t2 = _bn_scale_shift(p["bn2_gamma"], p["bn2_beta"],
                             p["bn2_mean"], p["bn2_var"], planes_p)
    w2 = _prep_conv3x3_w(p["conv2_w"], planes_p, planes_p, dot_dtype)
    b2 = _pad_channels(p["conv2_b"].astype(jnp.float32).reshape(1, -1), planes_p)
    out1p = jnp.pad(out1, ((0, 0), (1, 1), (1, 1), (0, 0)))

    has_sc = "short_w" in p
    if has_sc:
        ws = _prep_conv1x1_w(p["short_w"], cin_p, planes_p, dot_dtype)
        bs = _pad_channels(p["short_b"].astype(jnp.float32).reshape(1, -1), planes_p)

    if stride == 1:
        if has_sc:
            out = fused_conv3x3(out1p, s2, t2, w2, b2, out_dtype=out_dtype,
                                dot_dtype=dot_dtype, residual=xc,
                                short_w=ws, short_b=bs)
        else:  # identity shortcut, fused add
            out = fused_conv3x3(out1p, s2, t2, w2, b2, out_dtype=out_dtype,
                                dot_dtype=dot_dtype, residual=xc)
    else:
        # stride != 1  =>  the PyTorch module always has a 1x1-conv shortcut.
        assert has_sc
        # TODO(synk): stride>1 computes the stride-1 conv and subsamples (wasted MXU
        # work); a strided in-kernel tap slice would avoid it.
        full = fused_conv3x3(out1p, s2, t2, w2, b2,
                             out_dtype=out_dtype, dot_dtype=dot_dtype)
        out2 = full[:, ::stride, ::stride, :]
        ho, wo = out2.shape[1], out2.shape[2]
        xs = xc[:, ::stride, ::stride, :]
        out = shortcut_matmul_add(
            xs.reshape(n * ho * wo, cin_p), ws, bs,
            out2.reshape(n * ho * wo, planes_p),
            dot_dtype=dot_dtype).reshape(n, ho, wo, planes_p)

    out = out[..., :planes]
    return jnp.transpose(out, (0, 3, 1, 2))


# ----------------------------------------------------------------------------
# Pure-JAX reference (for the correctness check)
# ----------------------------------------------------------------------------
def _ref_forward(x, p, stride=1):
    def bn(x, g, b, m, v):
        return ((x - m[None, :, None, None]) / jnp.sqrt(v[None, :, None, None] + 1e-5)
                * g[None, :, None, None] + b[None, :, None, None])

    dn = ("NCHW", "OIHW", "NCHW")
    a1 = jax.nn.relu(bn(x, p["bn1_gamma"], p["bn1_beta"], p["bn1_mean"], p["bn1_var"]))
    o1 = lax.conv_general_dilated(a1, p["conv1_w"], (1, 1), ((1, 1), (1, 1)),
                                  dimension_numbers=dn) + p["conv1_b"][None, :, None, None]
    a2 = jax.nn.relu(bn(o1, p["bn2_gamma"], p["bn2_beta"], p["bn2_mean"], p["bn2_var"]))
    o2 = lax.conv_general_dilated(a2, p["conv2_w"], (stride, stride), ((1, 1), (1, 1)),
                                  dimension_numbers=dn) + p["conv2_b"][None, :, None, None]
    if "short_w" in p:
        sc = lax.conv_general_dilated(x, p["short_w"], (stride, stride), ((0, 0), (0, 0)),
                                      dimension_numbers=dn) + p["short_b"][None, :, None, None]
    else:
        sc = x
    return o2 + sc


# ----------------------------------------------------------------------------
# Main
# ----------------------------------------------------------------------------
def _make_params(key, in_planes, planes, stride):
    ks = jax.random.split(key, 16)
    p = {
        "bn1_gamma": 1.0 + 0.1 * jax.random.normal(ks[0], (in_planes,), jnp.float32),
        "bn1_beta": 0.1 * jax.random.normal(ks[1], (in_planes,), jnp.float32),
        "bn1_mean": 0.1 * jax.random.normal(ks[2], (in_planes,), jnp.float32),
        "bn1_var": jax.random.uniform(ks[3], (in_planes,), jnp.float32, 0.5, 1.5),
        "conv1_w": 0.1 * jax.random.normal(ks[4], (planes, in_planes, 3, 3), jnp.float32),
        "conv1_b": 0.1 * jax.random.normal(ks[5], (planes,), jnp.float32),
        "bn2_gamma": 1.0 + 0.1 * jax.random.normal(ks[6], (planes,), jnp.float32),
        "bn2_beta": 0.1 * jax.random.normal(ks[7], (planes,), jnp.float32),
        "bn2_mean": 0.1 * jax.random.normal(ks[8], (planes,), jnp.float32),
        "bn2_var": jax.random.uniform(ks[9], (planes,), jnp.float32, 0.5, 1.5),
        "conv2_w": 0.1 * jax.random.normal(ks[10], (planes, planes, 3, 3), jnp.float32),
        "conv2_b": 0.1 * jax.random.normal(ks[11], (planes,), jnp.float32),
    }
    if stride != 1 or in_planes != planes:
        p["short_w"] = 0.1 * jax.random.normal(ks[12], (planes, in_planes, 1, 1), jnp.float32)
        p["short_b"] = 0.1 * jax.random.normal(ks[13], (planes,), jnp.float32)
    return p


if __name__ == "__main__":
    N, H, W = 2, 16, 16
    # (in_planes, planes, stride): exercises the fused 1x1-conv shortcut path, the
    # fused identity-shortcut path, and the strided conv2 + strided shortcut path.
    configs = [(4, 8, 1), (8, 8, 1), (4, 8, 2)]

    key = jax.random.PRNGKey(0)
    for (cin, planes, stride) in configs:
        key, pk, xk = jax.random.split(key, 3)
        params = _make_params(pk, cin, planes, stride)
        x = jax.random.normal(xk, (N, cin, H, W), jnp.float32)  # NCHW like PyTorch

        ref = jax.block_until_ready(_ref_forward(x, params, stride=stride))

        # Exact-semantics check with f32 MXU inputs (tight tolerance).
        out32 = jax.block_until_ready(
            wide_basic_forward(x, params, stride=stride, dot_dtype=jnp.float32))
        assert out32.shape == ref.shape, (out32.shape, ref.shape)
        err32 = float(jnp.max(jnp.abs(out32 - ref)))
        assert err32 < 5e-3, err32

        # Optimized bf16-MXU path (accumulation in f32), looser tolerance.
        outbf = jax.block_until_ready(
            wide_basic_forward(x, params, stride=stride, dot_dtype=jnp.bfloat16))
        assert outbf.shape == ref.shape, (outbf.shape, ref.shape)
        errbf = float(jnp.max(jnp.abs(outbf - ref)))
        assert errbf < 6e-2, errbf

    print("KERNEL_OK")
</pallas_src>

<mosaic_0001>
module attributes {stable_mosaic.version = 11 : i64} {
  func.func @kernel(%arg0: i32, %arg1: memref<1x18x18x128xf32, #tpu.memory_space<vmem>>, %arg2: memref<1x128xf32, #tpu.memory_space<vmem>>, %arg3: memref<1x128xf32, #tpu.memory_space<vmem>>, %arg4: memref<1152x128xf32, #tpu.memory_space<vmem>>, %arg5: memref<1x128xf32, #tpu.memory_space<vmem>>, %arg6: memref<1x16x16x128xf32, #tpu.memory_space<vmem>>) attributes {dimension_semantics = [#tpu.dimension_semantics<parallel>], iteration_bounds = array<i64: 2>, scalar_prefetch = 0 : i64, scratch_operands = 0 : i64, tpu.core_type = #tpu.core_type<tc>, window_params = [{transform_indices = @transform_0, window_bounds = array<i64: 1, 18, 18, 128>}, {pipeline_mode = #tpu.pipeline_mode<synchronous>, transform_indices = @transform_1, window_bounds = array<i64: 1, 128>}, {pipeline_mode = #tpu.pipeline_mode<synchronous>, transform_indices = @transform_2, window_bounds = array<i64: 1, 128>}, {pipeline_mode = #tpu.pipeline_mode<synchronous>, transform_indices = @transform_3, window_bounds = array<i64: 1152, 128>}, {pipeline_mode = #tpu.pipeline_mode<synchronous>, transform_indices = @transform_4, window_bounds = array<i64: 1, 128>}, {transform_indices = @transform_5, window_bounds = array<i64: 1, 16, 16, 128>}]} {
    %c0 = arith.constant 0 : index
    %c0_0 = arith.constant 0 : index
    %c0_1 = arith.constant 0 : index
    %c0_2 = arith.constant 0 : index
    %0 = vector.load %arg1[%c0, %c0_0, %c0_1, %c0_2] : memref<1x18x18x128xf32, #tpu.memory_space<vmem>>, vector<1x18x18x128xf32>
    %1 = vector.shape_cast %0 : vector<1x18x18x128xf32> to vector<18x18x128xf32>
    %c0_3 = arith.constant 0 : index
    %c0_4 = arith.constant 0 : index
    %2 = vector.load %arg2[%c0_3, %c0_4] : memref<1x128xf32, #tpu.memory_space<vmem>>, vector<1x128xf32>
    %3 = vector.shape_cast %2 : vector<1x128xf32> to vector<1x1x128xf32>
    %4 = vector.broadcast %3 : vector<1x1x128xf32> to vector<18x18x128xf32>
    %5 = arith.mulf %1, %4 : vector<18x18x128xf32>
    %c0_5 = arith.constant 0 : index
    %c0_6 = arith.constant 0 : index
    %6 = vector.load %arg3[%c0_5, %c0_6] : memref<1x128xf32, #tpu.memory_space<vmem>>, vector<1x128xf32>
    %7 = vector.shape_cast %6 : vector<1x128xf32> to vector<1x1x128xf32>
    %8 = vector.broadcast %7 : vector<1x1x128xf32> to vector<18x18x128xf32>
    %9 = arith.addf %5, %8 : vector<18x18x128xf32>
    %cst = arith.constant 0.000000e+00 : f32
    %10 = vector.broadcast %cst : f32 to vector<18x18x128xf32>
    %11 = arith.maximumf %9, %10 : vector<18x18x128xf32>
    %12 = tpu.iota {dimensions = array<i32: 0>} : vector<18x18x1xi32>
    %13 = tpu.iota {dimensions = array<i32: 1>} : vector<18x18x1xi32>
    %c1_i32 = arith.constant 1 : i32
    %14 = vector.broadcast %c1_i32 : i32 to vector<18x18x1xi32>
    %15 = arith.cmpi sge, %12, %14 : vector<18x18x1xi32>
    %c16_i32 = arith.constant 16 : i32
    %16 = vector.broadcast %c16_i32 : i32 to vector<18x18x1xi32>
    %17 = arith.cmpi sle, %12, %16 : vector<18x18x1xi32>
    %18 = arith.andi %15, %17 : vector<18x18x1xi1>
    %c1_i32_7 = arith.constant 1 : i32
    %19 = vector.broadcast %c1_i32_7 : i32 to vector<18x18x1xi32>
    %20 = arith.cmpi sge, %13, %19 : vector<18x18x1xi32>
    %21 = arith.andi %18, %20 : vector<18x18x1xi1>
    %c16_i32_8 = arith.constant 16 : i32
    %22 = vector.broadcast %c16_i32_8 : i32 to vector<18x18x1xi32>
    %23 = arith.cmpi sle, %13, %22 : vector<18x18x1xi32>
    %24 = arith.andi %21, %23 : vector<18x18x1xi1>
    %cst_9 = arith.constant 0.000000e+00 : f32
    %25 = vector.shape_cast %24 : vector<18x18x1xi1> to vector<18x18x1xi1>
    %26 = vector.broadcast %25 : vector<18x18x1xi1> to vector<18x18x128xi1>
    %27 = vector.broadcast %cst_9 : f32 to vector<18x18x128xf32>
    %28 = arith.select %26, %11, %27 : vector<18x18x128xi1>, vector<18x18x128xf32>
    %29 = vector.extract_strided_slice %28 {offsets = [0, 0, 0], sizes = [18, 16, 128], strides = [1, 1, 1]} : vector<18x18x128xf32> to vector<18x16x128xf32>
    %30 = vector.extract_strided_slice %28 {offsets = [0, 1, 0], sizes = [18, 16, 128], strides = [1, 1, 1]} : vector<18x18x128xf32> to vector<18x16x128xf32>
    %31 = vector.extract_strided_slice %28 {offsets = [0, 2, 0], sizes = [18, 16, 128], strides = [1, 1, 1]} : vector<18x18x128xf32> to vector<18x16x128xf32>
    %32 = vector.extract_strided_slice %29 {offsets = [0, 0, 0], sizes = [16, 16, 128], strides = [1, 1, 1]} : vector<18x16x128xf32> to vector<16x16x128xf32>
    %33 = vector.shape_cast %32 : vector<16x16x128xf32> to vector<256x128xf32>
    %34 = vector.extract_strided_slice %30 {offsets = [0, 0, 0], sizes = [16, 16, 128], strides = [1, 1, 1]} : vector<18x16x128xf32> to vector<16x16x128xf32>
    %35 = vector.shape_cast %34 : vector<16x16x128xf32> to vector<256x128xf32>
    %36 = vector.extract_strided_slice %31 {offsets = [0, 0, 0], sizes = [16, 16, 128], strides = [1, 1, 1]} : vector<18x16x128xf32> to vector<16x16x128xf32>
    %37 = vector.shape_cast %36 : vector<16x16x128xf32> to vector<256x128xf32>
    %38 = vector.extract_strided_slice %29 {offsets = [1, 0, 0], sizes = [16, 16, 128], strides = [1, 1, 1]} : vector<18x16x128xf32> to vector<16x16x128xf32>
    %39 = vector.shape_cast %38 : vector<16x16x128xf32> to vector<256x128xf32>
    %40 = vector.extract_strided_slice %30 {offsets = [1, 0, 0], sizes = [16, 16, 128], strides = [1, 1, 1]} : vector<18x16x128xf32> to vector<16x16x128xf32>
    %41 = vector.shape_cast %40 : vector<16x16x128xf32> to vector<256x128xf32>
    %42 = vector.extract_strided_slice %31 {offsets = [1, 0, 0], sizes = [16, 16, 128], strides = [1, 1, 1]} : vector<18x16x128xf32> to vector<16x16x128xf32>
    %43 = vector.shape_cast %42 : vector<16x16x128xf32> to vector<256x128xf32>
    %44 = vector.extract_strided_slice %29 {offsets = [2, 0, 0], sizes = [16, 16, 128], strides = [1, 1, 1]} : vector<18x16x128xf32> to vector<16x16x128xf32>
    %45 = vector.shape_cast %44 : vector<16x16x128xf32> to vector<256x128xf32>
    %46 = vector.extract_strided_slice %30 {offsets = [2, 0, 0], sizes = [16, 16, 128], strides = [1, 1, 1]} : vector<18x16x128xf32> to vector<16x16x128xf32>
    %47 = vector.shape_cast %46 : vector<16x16x128xf32> to vector<256x128xf32>
    %48 = vector.extract_strided_slice %31 {offsets = [2, 0, 0], sizes = [16, 16, 128], strides = [1, 1, 1]} : vector<18x16x128xf32> to vector<16x16x128xf32>
    %49 = vector.shape_cast %48 : vector<16x16x128xf32> to vector<256x128xf32>
    %50 = tpu.concatenate %33, %35, %37, %39, %41, %43, %45, %47, %49 in 1 : vector<256x128xf32>, vector<256x128xf32>, vector<256x128xf32>, vector<256x128xf32>, vector<256x128xf32>, vector<256x128xf32>, vector<256x128xf32>, vector<256x128xf32>, vector<256x128xf32> -> vector<256x1152xf32>
    %c0_10 = arith.constant 0 : index
    %c0_11 = arith.constant 0 : index
    %51 = vector.load %arg4[%c0_10, %c0_11] : memref<1152x128xf32, #tpu.memory_space<vmem>>, vector<1152x128xf32>
    %cst_12 = arith.constant dense<0.000000e+00> : vector<256x128xf32>
    %52 = tpu.matmul %50, %51, %cst_12 {dimension_numbers = #tpu.dot_dimension_numbers<[1], [0], [0], [1], [0, 0, 1, 1], [], []>} : vector<256x1152xf32>, vector<1152x128xf32>, vector<256x128xf32> -> vector<256x128xf32>
    %c0_13 = arith.constant 0 : index
    %c0_14 = arith.constant 0 : index
    %53 = vector.load %arg5[%c0_13, %c0_14] : memref<1x128xf32, #tpu.memory_space<vmem>>, vector<1x128xf32>
    %54 = vector.broadcast %53 : vector<1x128xf32> to vector<256x128xf32>
    %55 = arith.addf %52, %54 : vector<256x128xf32>
    %56 = vector.shape_cast %55 : vector<256x128xf32> to vector<1x16x16x128xf32>
    %c0_15 = arith.constant 0 : index
    %c0_16 = arith.constant 0 : index
    %c0_17 = arith.constant 0 : index
    %c0_18 = arith.constant 0 : index
    %57 = vector.load %arg6[%c0_15, %c0_16, %c0_17, %c0_18] : memref<1x16x16x128xf32, #tpu.memory_space<vmem>>, vector<1x16x16x128xf32>
    tpu.vector_store %arg6[%c0_15, %c0_16, %c0_17, %c0_18], %56 {strides = array<i32>} : memref<1x16x16x128xf32, #tpu.memory_space<vmem>>, vector<1x16x16x128xf32>,
    return
  }
  func.func @transform_0(%arg0: i32) -> (i32, i32, i32, i32) {
    %c0_i32 = arith.constant 0 : i32
    %c0_i32_0 = arith.constant 0 : i32
    %c0_i32_1 = arith.constant 0 : i32
    %c0_i32_2 = arith.constant 0 : i32
    return %arg0, %c0_i32, %c0_i32_0, %c0_i32_1 : i32, i32, i32, i32
  }
  func.func @transform_1(%arg0: i32) -> (i32, i32) {
    %c0_i32 = arith.constant 0 : i32
    %c0_i32_0 = arith.constant 0 : i32
    %c0_i32_1 = arith.constant 0 : i32
    return %c0_i32, %c0_i32_0 : i32, i32
  }
  func.func @transform_2(%arg0: i32) -> (i32, i32) {
    %c0_i32 = arith.constant 0 : i32
    %c0_i32_0 = arith.constant 0 : i32
    %c0_i32_1 = arith.constant 0 : i32
    return %c0_i32, %c0_i32_0 : i32, i32
  }
  func.func @transform_3(%arg0: i32) -> (i32, i32) {
    %c0_i32 = arith.constant 0 : i32
    %c0_i32_0 = arith.constant 0 : i32
    %c0_i32_1 = arith.constant 0 : i32
    return %c0_i32, %c0_i32_0 : i32, i32
  }
  func.func @transform_4(%arg0: i32) -> (i32, i32) {
    %c0_i32 = arith.constant 0 : i32
    %c0_i32_0 = arith.constant 0 : i32
    %c0_i32_1 = arith.constant 0 : i32
    return %c0_i32, %c0_i32_0 : i32, i32
  }
  func.func @transform_5(%arg0: i32) -> (i32, i32, i32, i32) {
    %c0_i32 = arith.constant 0 : i32
    %c0_i32_0 = arith.constant 0 : i32
    %c0_i32_1 = arith.constant 0 : i32
    %c0_i32_2 = arith.constant 0 : i32
    return %arg0, %c0_i32, %c0_i32_0, %c0_i32_1 : i32, i32, i32, i32
  }
}

</mosaic_0001>

<bundles_post_ra>
// kernel: tpu_custom_call.1
= control target key start
LH: loop header
LB: loop body
LE: loop exit
PB: predicated region body
PF: predicated region fallthrough
CT: control target
= control target key end

     0   :  { %10 = vsyncpa [#allocation3], 0  ;;  %s4977_s0 = inlined_call_operand.vmem [shape: f32[2,18,18,128], index: 0, kind: input, shape index: {}]   ;;  %s4978_s1 = inlined_call_operand.vmem [shape: f32[1,128], index: 1, kind: input, shape index: {}]   ;;  %s4979_s2 = inlined_call_operand.vmem [shape: f32[1,128], index: 2, kind: input, shape index: {}]   ;;  %s4980_s3 = inlined_call_operand.vmem [shape: f32[1152,128], index: 3, kind: input, shape index: {}]   ;;  %s4981_s4 = inlined_call_operand.vmem [shape: f32[1,128], index: 4, kind: input, shape index: {}]   ;;  %s4982_s5 = inlined_call_operand.hbm [shape: f32[2,16,16,128], index: 5, kind: output, shape index: {}]  }
   0x1   :  { %12 = vsyncpa [#allocation3 + $0x1], 0  ;;  %s2991_s18 = smov 0   ;;  %s2993_s19 = smov 0  }
   0x2   :  { %s2995_s20 = smov 0   ;;  %s2997_s21 = smov 0  }
   0x3 LB: > { %s3012_s22 = sadd.s32 4294967295, %s2954_s21   ;;  %s2233_s23 = sadd.s32 4294967294, %s2954_s21   ;;  %s2954_s21 = sphi %s2997_s21, %s5202_s21   ;;  %s2950_s20 = sphi %s2995_s20, %s5201_s20   ;;  %s2946_s19 = sphi %s2993_s19, %s5200_s19   ;;  %s2942_s18 = sphi %s2991_s18, %s5199_s18  }
   0x4   : > { %s3016_s24 = sadd.s32 1, %s2954_s21   ;;  %s135_s25 = sadd.s32 1, %s2950_s20 }
   0x5   : > { %s132_s26 = ssub.s32 %s2954_s21, %s3016_s24  ;;  %p145_p0 = scmp.ne.s32.totalorder %s2950_s20, %s2946_s19 }
   0x6   : > { %p133_p1 = scmp.eq.s32.totalorder %s132_s26, 0  ;;  %p146_p2 = scmp.eq.s32.totalorder %s3012_s22, 1 }
   0x7   : > { %p151_p3 = scmp.ne.s32.totalorder %s2946_s19, %s2942_s18  ;;  %p152_p4 = scmp.eq.s32.totalorder %s2233_s23, 1 }
   0x8   : > { %s3027_s27 = scalar_select %p133_p1, %s2950_s20, %s135_s25  }
   0x9   : > { %p3029_p5 = por %p146_p2, %p145_p0  ;;  %p3033_p6 = por %p152_p4, %p151_p3 }
   0xa   : > { %p2236_p7 = scmp.ge.s32.totalorder %s2954_s21, 1  ;;  %p190_p8 = scmp.lt.s32.totalorder %s2954_s21, 3 }
   0xc   : > { %p191_p9 = pnand %p2236_p7, %p190_p8 }
   0xe   : > { %194 = sbr.rel (%p191_p9) target bundleno = 603 (0x25b), region = 40 }
  0x15   : > { %v849_v0 = vld [vmem:[%s4980_s3] sm:$0xff]  ;;  %v850_v1 = vld [vmem:[%s4980_s3 + $0x8] sm:$0xff]  ;;  %v4985_v3 = vmov 0.0|0.0   ;;  %v851_v6 = vld [vmem:[%s4980_s3 + $0x10] sm:$0xff]  ;;  %v4983_v8 = vmov 0.0   ;;  %p218_p10 = scmp.lt.s32.totalorder %s3012_s22, 1  ;;  %v453_v37 = vlaneseq }
  0x16   : > { %v881_v2 = vld [vmem:[%s4980_s3 + $0x100] sm:$0xff]  ;;  %2422 = vmatprep.subr.bf16.mxu1 %v4985_v3  ;;  %2470 = vmatprep.subr.bf16.mxu0 %v4985_v3  ;;  %v2423_v4 = vpack.c.bf16 %v850_v1, %v849_v0  ;;  %v882_v5 = vld [vmem:[%s4980_s3 + $0x108] sm:$0xff]  ;;  %v852_v7 = vld [vmem:[%s4980_s3 + $0x18] sm:$0xff]  ;;  %v3060_v9 = vrot.slane %v4983_v8, 1  ;;  %vm589_vm2 = vcmask 1046528   ;;  %vm702_vm3 = vcmask 1045504  }
  0x17   : > { %v2471_v10 = vpack.c.bf16 %v882_v5, %v881_v2  ;;  %v883_v11 = vld [vmem:[%s4980_s3 + $0x110] sm:$0xff]  ;;  %v884_v12 = vld [vmem:[%s4980_s3 + $0x118] sm:$0xff]  ;;  %v2426_v13 = vpack.c.bf16 %v852_v7, %v851_v6  ;;  %v853_v15 = vld [vmem:[%s4980_s3 + $0x20] sm:$0xff]  ;;  %s219_s30 = scalar_select %p218_p10, %s3012_s22, 1  ;;  %v3158_v48 = vshrl.u32 %v453_v37, 7 }
  0x18   : > { %5081 = vst [vmem:[#allocation5_spill] sm:$0xff] %v3060_v9  ;;  %2424 = vmatpush1.bf16.msra.mxu1 %v2423_v4  ;;  %1064 = vmatprep.mubr.f32.mxu1 %v3060_v9  ;;  %v2474_v14 = vpack.c.bf16 %v884_v12, %v883_v11  ;;  %v854_v16 = vld [vmem:[%s4980_s3 + $0x28] sm:$0xff]  ;;  %v885_v17 = vld [vmem:[%s4980_s3 + $0x120] sm:$0xff]  ;;  %v855_v21 = vld [vmem:[%s4980_s3 + $0x30] sm:$0xff]  ;;  %s215_s25 = sand.u32 1, %s2946_s19   ;;  %s2293_s6 = sshll.u32 %s3012_s22, 12 }
  0x19   : > { %2472 = vmatpush1.bf16.msra.mxu0 %v2471_v10  ;;  %2425 = vmatprep.subr.bf16.mxu1 %v4985_v3  ;;  %v886_v18 = vld [vmem:[%s4980_s3 + $0x128] sm:$0xff]  ;;  %v2429_v19 = vpack.c.bf16 %v854_v16, %v853_v15  ;;  %v856_v22 = vld [vmem:[%s4980_s3 + $0x38] sm:$0xff]  ;;  %v887_v23 = vld [vmem:[%s4980_s3 + $0x130] sm:$0xff]  ;;  %s2846_s14 = smul.u32 432, %s219_s30  ;;  %vm457_vm0 = vcmp.ge.s32.totalorder %v3158_v48, 1  ;;  %s2237_s26 = sshll.u32 %s215_s25, 8 }
  0x1a   : > { %2473 = vmatprep.subr.bf16.mxu0 %v4985_v3  ;;  %v2477_v20 = vpack.c.bf16 %v886_v18, %v885_v17  ;;  %v888_v24 = vld [vmem:[%s4980_s3 + $0x138] sm:$0xff]  ;;  %v2432_v25 = vpack.c.bf16 %v856_v22, %v855_v21  ;;  %v857_v27 = vld [vmem:[%s4980_s3 + $0x40] sm:$0xff]  ;;  %v858_v28 = vld [vmem:[%s4980_s3 + $0x48] sm:$0xff]  ;;  %s4827_s30 = scalar_lea.vmem [#allocation2], %s2237_s26  ;;  %s4927_s11 = scalar_lea.hbm %s4982_s5, %s2293_s6 }
  0x1b   : > { %v2480_v26 = vpack.c.bf16 %v888_v24, %v887_v23  ;;  %v889_v29 = vld [vmem:[%s4980_s3 + $0x140] sm:$0xff]  ;;  %v890_v30 = vld [vmem:[%s4980_s3 + $0x148] sm:$0xff]  ;;  %v2435_v31 = vpack.c.bf16 %v858_v28, %v857_v27  ;;  %v859_v33 = vld [vmem:[%s4980_s3 + $0x50] sm:$0xff]  ;;  %s3130_s9 = scalar_lea.vmem %s4977_s0, %s2846_s14  ;;  %s2171_s7 = sshll.u32 %s4827_s30, 4  ;;  %s4929_s7 = int_to_ptr.vmem [resolvable:$true] %s2171_s7 }
  0x1c   : > { %2427 = vmatpush1.bf16.msra.mxu1 %v2426_v13  ;;  %v2483_v32 = vpack.c.bf16 %v890_v30, %v889_v29  ;;  %v860_v34 = vld [vmem:[%s4980_s3 + $0x58] sm:$0xff]  ;;  %v891_v35 = vld [vmem:[%s4980_s3 + $0x150] sm:$0xff]  ;;  %v861_v40 = vld [vmem:[%s4980_s3 + $0x60] sm:$0xff]  ;;  %s4936_s22 = scalar_lea.sflag [#allocation3], %s215_s25  ;;  %s2892_s12 = scalar_lea.vmem %s4929_s7, 4096 }
  0x1d   : > { %2475 = vmatpush1.bf16.msra.mxu0 %v2474_v14  ;;  %2428 = vmatprep.subr.bf16.mxu1 %v4985_v3  ;;  %v892_v36 = vld [vmem:[%s4980_s3 + $0x158] sm:$0xff]  ;;  %v2438_v38 = vpack.c.bf16 %v860_v34, %v859_v33  ;;  %v862_v41 = vld [vmem:[%s4980_s3 + $0x68] sm:$0xff]  ;;  %v893_v42 = vld [vmem:[%s4980_s3 + $0x160] sm:$0xff]  ;;  %p2893_p11 = scmp.ne.s32.totalorder %s4929_s7, %s2892_s12  ;;  %s2958_s13 = smov [#allocation2]  }
  0x1e   : > { %2476 = vmatprep.subr.bf16.mxu0 %v4985_v3  ;;  %v2486_v39 = vpack.c.bf16 %v892_v36, %v891_v35  ;;  %v894_v43 = vld [vmem:[%s4980_s3 + $0x168] sm:$0xff]  ;;  %v226_v44 = vld [vmem:[%s3130_s9 + $0x18] sm:$0xff]  ;;  %v3150_v45 = vld [vmem:[%s4978_s1] ss:$0 sm:$0xff]  ;;  %v2441_v49 = vpack.c.bf16 %v862_v41, %v861_v40  ;;  %s2896_s15 = sshll.u32 %s2958_s13, 4  ;;  %s2897_s15 = int_to_ptr.vmem [resolvable:$false] %s2896_s15 }
  0x1f   : > { %v287_v46 = vmul.f32 %v3150_v45, %v226_v44  ;;  %v3156_v47 = vld [vmem:[%s4979_s2] ss:$0 sm:$0xff]  ;;  %v2489_v50 = vpack.c.bf16 %v894_v43, %v893_v42  ;;  %v863_v51 = vld [vmem:[%s4980_s3 + $0x70] sm:$0xff]  ;;  %v864_v52 = vld [vmem:[%s4980_s3 + $0x78] sm:$0xff]  ;;  %p2894_p12 = pnand %p2893_p11, %p3029_p5  ;;  %s2898_s16 = scalar_lea.vmem %s2897_s15, 8192 }
  0x20   : > { %2430 = vmatpush1.bf16.msra.mxu1 %v2429_v19  ;;  %v895_v54 = vld [vmem:[%s4980_s3 + $0x170] sm:$0xff]  ;;  %v896_v55 = vld [vmem:[%s4980_s3 + $0x178] sm:$0xff]  ;;  %v2444_v57 = vpack.c.bf16 %v864_v52, %v863_v51  ;;  %v865_v59 = vld [vmem:[%s4980_s3 + $0x80] sm:$0xff]  ;;  %p2899_p0 = scmp.lt.s32.totalorder %s4929_s7, %s2897_s15  ;;  %p2900_p1 = scmp.lt.s32.totalorder %s2898_s16, %s2892_s12 }
  0x21   : > { %2478 = vmatpush1.bf16.msra.mxu0 %v2477_v20  ;;  %2431 = vmatprep.subr.bf16.mxu1 %v4985_v3  ;;  %v348_v53 = vadd.f32 %v3156_v47, %v287_v46  ;;  %v2492_v58 = vpack.c.bf16 %v896_v55, %v895_v54  ;;  %v866_v60 = vld [vmem:[%s4980_s3 + $0x88] sm:$0xff]  ;;  %v897_v61 = vld [vmem:[%s4980_s3 + $0x180] sm:$0xff]  ;;  %v867_v1 = vld [vmem:[%s4980_s3 + $0x90] sm:$0xff]  ;;  %v3302_v55 = vadd.s32 16, %v3158_v48  ;;  %p2895_p13 = pneg %p2894_p12 }
  0x22   : > { %2479 = vmatprep.subr.bf16.mxu0 %v4985_v3  ;;  %v898_v62 = vld [vmem:[%s4980_s3 + $0x188] sm:$0xff]  ;;  %v2447_v63 = vpack.c.bf16 %v866_v60, %v865_v59  ;;  %v868_v2 = vld [vmem:[%s4980_s3 + $0x98] sm:$0xff]  ;;  %v899_v4 = vld [vmem:[%s4980_s3 + $0x190] sm:$0xff]  ;;  %p2901_p2 = por %p2900_p1, %p2899_p0 }
  0x23   : > { %v3175_v56 = vmax.f32 %v348_v53, 0.0  ;;  %v2495_v0 = vpack.c.bf16 %v898_v62, %v897_v61  ;;  %v900_v5 = vld [vmem:[%s4980_s3 + $0x198] sm:$0xff]  ;;  %v2450_v6 = vpack.c.bf16 %v868_v2, %v867_v1  ;;  %v869_v10 = vld [vmem:[%s4980_s3 + $0xa0] sm:$0xff]  ;;  %v870_v11 = vld [vmem:[%s4980_s3 + $0xa8] sm:$0xff]  ;;  %vm468_vm1 = vcmp.le.s32.totalorder %v3302_v55, 16 }
  0x24   : > { %2433 = vmatpush1.bf16.msra.mxu1 %v2432_v25  ;;  %v2498_v7 = vpack.c.bf16 %v900_v5, %v899_v4  ;;  %v901_v12 = vld [vmem:[%s4980_s3 + $0x1a0] sm:$0xff]  ;;  %v902_v13 = vld [vmem:[%s4980_s3 + $0x1a8] sm:$0xff]  ;;  %v2453_v14 = vpack.c.bf16 %v870_v11, %v869_v10  ;;  %v871_v16 = vld [vmem:[%s4980_s3 + $0xb0] sm:$0xff]  ;;  %p2902_p3 = pnand %p2901_p2, %p2895_p13 }
  0x25   : > { %2481 = vmatpush1.bf16.msra.mxu0 %v2480_v26  ;;  %2434 = vmatprep.subr.bf16.mxu1 %v4985_v3  ;;  %v2501_v15 = vpack.c.bf16 %v902_v13, %v901_v12  ;;  %v872_v17 = vld [vmem:[%s4980_s3 + $0xb8] sm:$0xff]  ;;  %v903_v18 = vld [vmem:[%s4980_s3 + $0x1b0] sm:$0xff]  ;;  %v873_v22 = vld [vmem:[%s4980_s3 + $0xc0] sm:$0xff]  ;;  %v490_v4 = vsel %vm457_vm0, %v3175_v56, 0.0 }
  0x26   : > { %2482 = vmatprep.subr.bf16.mxu0 %v4985_v3  ;;  %2257 = vmatprep.mubr.msk.f32.mxu0 %vm457_vm0, %v3175_v56  ;;  %v904_v19 = vld [vmem:[%s4980_s3 + $0x1b8] sm:$0xff]  ;;  %v2456_v20 = vpack.c.bf16 %v872_v17, %v871_v16  ;;  %v874_v23 = vld [vmem:[%s4980_s3 + $0xc8] sm:$0xff]  ;;  %v905_v24 = vld [vmem:[%s4980_s3 + $0x1c0] sm:$0xff] }
  0x27   : > { %v2504_v21 = vpack.c.bf16 %v904_v19, %v903_v18  ;;  %v906_v25 = vld [vmem:[%s4980_s3 + $0x1c8] sm:$0xff]  ;;  %v2459_v26 = vpack.c.bf16 %v874_v23, %v873_v22  ;;  %v875_v28 = vld [vmem:[%s4980_s3 + $0xd0] sm:$0xff]  ;;  %v876_v29 = vld [vmem:[%s4980_s3 + $0xd8] sm:$0xff] }
  0x28   : > { %2436 = vmatpush1.bf16.msra.mxu1 %v2435_v31  ;;  %v2507_v27 = vpack.c.bf16 %v906_v25, %v905_v24  ;;  %v907_v30 = vld [vmem:[%s4980_s3 + $0x1d0] sm:$0xff]  ;;  %v908_v31 = vld [vmem:[%s4980_s3 + $0x1d8] sm:$0xff]  ;;  %v228_v33 = vld [vmem:[%s3130_s9 + $0x28] sm:$0x3]  ;;  %v2462_v34 = vpack.c.bf16 %v876_v29, %v875_v28 }
  0x29   : > { %2484 = vmatpush1.bf16.msra.mxu0 %v2483_v32  ;;  %2437 = vmatprep.subr.bf16.mxu1 %v4985_v3  ;;  %v227_v32 = vld [vmem:[%s3130_s9 + $0x20] sm:$0xff]  ;;  %v2510_v35 = vpack.c.bf16 %v908_v31, %v907_v30  ;;  %v878_v37 = vld [vmem:[%s4980_s3 + $0xe8] sm:$0xff]  ;;  %v289_v41 = vmul.f32 %v3150_v45, %v228_v33  ;;  %v879_v44 = vld [vmem:[%s4980_s3 + $0xf0] sm:$0xff] }
  0x2a   : > { %2485 = vmatprep.subr.bf16.mxu0 %v4985_v3  ;;  %v877_v36 = vld [vmem:[%s4980_s3 + $0xe0] sm:$0xff]  ;;  %v910_v40 = vld [vmem:[%s4980_s3 + $0x1e8] sm:$0xff]  ;;  %v880_v46 = vld [vmem:[%s4980_s3 + $0xf8] sm:$0xff] }
  0x2b   : > { %v2465_v42 = vpack.c.bf16 %v878_v37, %v877_v36  ;;  %v911_v51 = vld [vmem:[%s4980_s3 + $0x1f0] sm:$0xff]  ;;  %v912_v52 = vld [vmem:[%s4980_s3 + $0x1f8] sm:$0xff]  ;;  %v350_v53 = vadd.f32 %v3156_v47, %v289_v41  ;;  %v945_v61 = vld [vmem:[%s4980_s3 + $0x300] sm:$0xff] }
  0x2c   : > { %2439 = vmatpush1.bf16.msra.mxu1 %v2438_v38  ;;  %v288_v38 = vmul.f32 %v3150_v45, %v227_v32  ;;  %v230_v54 = vld [vmem:[%s3130_s9 + $0x38] sm:$0xff]  ;;  %v2516_v60 = vpack.c.bf16 %v912_v52, %v911_v51  ;;  %v946_v62 = vld [vmem:[%s4980_s3 + $0x308] sm:$0xff]  ;;  %v913_v1 = vld [vmem:[%s4980_s3 + $0x200] sm:$0xff] }
  0x2d   : > { %2487 = vmatpush1.bf16.msra.mxu0 %v2486_v39  ;;  %2440 = vmatprep.subr.bf16.mxu1 %v4985_v3  ;;  %v909_v39 = vld [vmem:[%s4980_s3 + $0x1e0] sm:$0xff]  ;;  %v914_v2 = vld [vmem:[%s4980_s3 + $0x208] sm:$0xff]  ;;  %v404_v5 = vmax.f32 %v350_v53, 0.0  ;;  %v3331_v10 = vpack.c.bf16 %v946_v62, %v945_v61  ;;  %v915_v16 = vld [vmem:[%s4980_s3 + $0x210] sm:$0xff] }
  0x2e   : > { %2488 = vmatprep.subr.bf16.mxu0 %v4985_v3  ;;  %v2513_v43 = vpack.c.bf16 %v910_v40, %v909_v39  ;;  %v232_v12 = vld [vmem:[%s3130_s9 + $0x48] sm:$0xff]  ;;  %v2519_v13 = vpack.c.bf16 %v914_v2, %v913_v1  ;;  %v916_v17 = vld [vmem:[%s4980_s3 + $0x218] sm:$0xff]  ;;  %v233_v19 = vld [vmem:[%s3130_s9 + $0x50] sm:$0xff] }
  0x2f   : > { %v947_v22 = vld [vmem:[%s4980_s3 + $0x310] sm:$0xff]  ;;  %v948_v23 = vld [vmem:[%s4980_s3 + $0x318] sm:$0xff]  ;;  %v293_v24 = vmul.f32 %v3150_v45, %v232_v12  ;;  %v2522_v28 = vpack.c.bf16 %v916_v17, %v915_v16  ;;  %v294_v29 = vmul.f32 %v3150_v45, %v233_v19  ;;  %v949_v41 = vld [vmem:[%s4980_s3 + $0x320] sm:$0xff] }
  0x30   : > { %2442 = vmatpush1.bf16.msra.mxu1 %v2441_v49  ;;  %v349_v49 = vadd.f32 %v3156_v47, %v288_v38  ;;  %v234_v25 = vld [vmem:[%s3130_s9 + $0x58] sm:$0x3]  ;;  %v3381_v36 = vpack.c.bf16 %v948_v23, %v947_v22  ;;  %v951_v2 = vld [vmem:[%s4980_s3 + $0x330] sm:$0xff]  ;;  %v921_v19 = vld [vmem:[%s4980_s3 + $0x240] sm:$0xff] }
  0x31   : > { %2490 = vmatpush1.bf16.msra.mxu0 %v2489_v50  ;;  %2443 = vmatprep.subr.bf16.mxu1 %v4985_v3  ;;  %v229_v50 = vld [vmem:[%s3130_s9 + $0x30] sm:$0xff]  ;;  %v295_v39 = vmul.f32 %v3150_v45, %v234_v25  ;;  %v354_v40 = vadd.f32 %v3156_v47, %v293_v24  ;;  %v238_v23 = vld [vmem:[%s3130_s9 + $0x78] sm:$0xff]  ;;  %v953_v24 = vld [vmem:[%s4980_s3 + $0x340] sm:$0xff] }
  0x32   : > { %2491 = vmatprep.subr.bf16.mxu0 %v4985_v3  ;;  %v290_v59 = vmul.f32 %v3150_v45, %v229_v50  ;;  %v954_v25 = vld [vmem:[%s4980_s3 + $0x348] sm:$0xff] }
  0x33   : > { %v356_v61 = vadd.f32 %v3156_v47, %v295_v39  ;;  %v3433_v62 = vmax.f32 %v354_v40, 0.0  ;;  %v3508_v39 = vpack.c.bf16 %v954_v25, %v953_v24 }
  0x34   : > { %2445 = vmatpush1.bf16.msra.mxu1 %v2444_v57  ;;  %v231_v57 = vld [vmem:[%s3130_s9 + $0x40] sm:$0x3]  ;;  %v351_v11 = vadd.f32 %v3156_v47, %v290_v59  ;;  %v919_v59 = vld [vmem:[%s4980_s3 + $0x230] sm:$0xff] }
  0x35   : > { %2493 = vmatpush1.bf16.msra.mxu0 %v2492_v58  ;;  %2446 = vmatprep.subr.bf16.mxu1 %v4985_v3  ;;  %v2468_v58 = vpack.c.bf16 %v880_v46, %v879_v44  ;;  %v355_v46 = vadd.f32 %v3156_v47, %v294_v29  ;;  %5085 = vst [vmem:[#allocation9_spill] sm:$0xff] %v3433_v62 }
  0x36   : > { %2494 = vmatprep.subr.bf16.mxu0 %v4985_v3 }
  0x38   : > { %2448 = vmatpush1.bf16.msra.mxu1 %v2447_v63  ;;  %v3313_v63 = vmax.f32 %v349_v49, 0.0  ;;  %v235_v49 = vld [vmem:[%s3130_s9 + $0x60] sm:$0xff] }
  0x39   : > { %2496 = vmatpush1.bf16.msra.mxu0 %v2495_v0  ;;  %2449 = vmatprep.subr.bf16.mxu1 %v4985_v3  ;;  %v291_v0 = vmul.f32 %v3150_v45, %v230_v54  ;;  %v236_v54 = vld [vmem:[%s3130_s9 + $0x68] sm:$0xff]  ;;  %v296_v1 = vmul.f32 %v3150_v45, %v235_v49 }
  0x3a   : > { %2497 = vmatprep.subr.bf16.mxu0 %v4985_v3  ;;  %v709_v31 = vrot.slane %v3313_v63, 2  ;;  %v297_v12 = vmul.f32 %v3150_v45, %v236_v54 }
  0x3b   : > { %v352_v18 = vadd.f32 %v3156_v47, %v291_v0  ;;  %v357_v22 = vadd.f32 %v3156_v47, %v296_v1  ;;  %v241_v1 = vld [vmem:[%s3130_s9 + $0x90] sm:$0xff] }
  0x3c   : > { %2451 = vmatpush1.bf16.msra.mxu1 %v2450_v6  ;;  %v292_v6 = vmul.f32 %v3150_v45, %v231_v57  ;;  %v358_v29 = vadd.f32 %v3156_v47, %v297_v12 }
  0x3d   : > { %2499 = vmatpush1.bf16.msra.mxu0 %v2498_v7  ;;  %2452 = vmatprep.subr.bf16.mxu1 %v4985_v3  ;;  %v3329_v7 = vrot.slane %v4983_v8, 2  ;;  %v3371_v33 = vmax.f32 %v352_v18, 0.0  ;;  %v410_v18 = vmax.f32 %v356_v61, 0.0 }
  0x3e   : > { %2500 = vmatprep.subr.bf16.mxu0 %v4985_v3 }
  0x3f   : > { %5082 = vst [vmem:[#allocation6_spill] sm:$0xff] %v3329_v7  ;;  %5084 = vst [vmem:[#allocation8_spill] sm:$0xff] %v3371_v33  ;;  %v601_v53 = vrot.slane %v3371_v33, 1 }
  0x40   : > { %2454 = vmatpush1.bf16.msra.mxu1 %v2453_v14  ;;  %v595_v14 = vrot.slane %v490_v4, 1 }
  0x41   : > { %2502 = vmatpush1.bf16.msra.mxu0 %v2501_v15  ;;  %2455 = vmatprep.subr.bf16.mxu1 %v4985_v3  ;;  %v596_v15 = vrot.slane %v3313_v63, 1 }
  0x42   : > { %2503 = vmatprep.subr.bf16.mxu0 %v4985_v3 }
  0x43   : > { %v3367_v30 = vsel %vm589_vm2, %v595_v14, %v596_v15 }
  0x44   : > { %2457 = vmatpush1.bf16.msra.mxu1 %v2456_v20  ;;  %v3348_v20 = vsel %vm468_vm1, %v404_v5, 0.0  ;;  %v237_v5 = vld [vmem:[%s3130_s9 + $0x70] sm:$0x3] }
  0x45   : > { %2505 = vmatpush1.bf16.msra.mxu0 %v2504_v21  ;;  %2458 = vmatprep.subr.bf16.mxu1 %v4985_v3  ;;  %v353_v21 = vadd.f32 %v3156_v47, %v292_v6  ;;  %v598_v32 = vrot.slane %v3348_v20, 1  ;;  %v714_v6 = vrot.slane %v3371_v33, 2 }
  0x46   : > { %2506 = vmatprep.subr.bf16.mxu0 %v4985_v3 }
  0x47   : > { %v407_v38 = vmax.f32 %v353_v21, 0.0  ;;  %v3410_v51 = vsel %vm589_vm2, %v596_v15, %v598_v32  ;;  %v3462_v15 = vsel %vm457_vm0, %v3433_v62, 0.0  ;;  %v298_v21 = vmul.f32 %v3150_v45, %v237_v5 }
  0x48   : > { %2460 = vmatpush1.bf16.msra.mxu1 %v2459_v26  ;;  %v3362_v26 = vmax.f32 %v351_v11, 0.0  ;;  %v3451_v11 = vmax.f32 %v355_v46, 0.0  ;;  %v718_v46 = vrot.slane %v3462_v15, 2 }
  0x49   : > { %2508 = vmatpush1.bf16.msra.mxu0 %v2507_v27  ;;  %2461 = vmatprep.subr.bf16.mxu1 %v4985_v3  ;;  %v708_v27 = vrot.slane %v490_v4, 2  ;;  %v952_v4 = vld [vmem:[%s4980_s3 + $0x338] sm:$0xff]  ;;  %v359_v40 = vadd.f32 %v3156_v47, %v298_v21 }
  0x4a   : > { %2509 = vmatprep.subr.bf16.mxu0 %v4985_v3  ;;  %5083 = vst [vmem:[#allocation7_spill] sm:$0xff] %v3362_v26  ;;  %v3386_v37 = vsel %vm457_vm0, %v3362_v26, 0.0  ;;  %5086 = vst [vmem:[#allocation10_spill] sm:$0xff] %v3451_v11  ;;  %v3466_v17 = vpack.c.bf16 %v952_v4, %v951_v2  ;;  %v719_v49 = vrot.slane %v3451_v11, 2 }
  0x4b   : > { %v3407_v50 = vsel %vm702_vm3, %v708_v27, %v709_v31  ;;  %v600_v52 = vrot.slane %v3386_v37, 1  ;;  %v713_v0 = vrot.slane %v3386_v37, 2  ;;  %v605_v27 = vrot.slane %v3462_v15, 1  ;;  %v926_v15 = vld [vmem:[%s4980_s3 + $0x268] sm:$0xff] }
  0x4c   : > { %2463 = vmatpush1.bf16.msra.mxu1 %v2462_v34  ;;  %v917_v34 = vld [vmem:[%s4980_s3 + $0x220] sm:$0xff]  ;;  %v3504_v37 = vsel %vm468_vm1, %v410_v18, 0.0  ;;  %v413_v5 = vmax.f32 %v359_v40, 0.0 }
  0x4d   : > { %2511 = vmatpush1.bf16.msra.mxu0 %v2510_v35  ;;  %2464 = vmatprep.subr.bf16.mxu1 %v4985_v3  ;;  %v918_v35 = vld [vmem:[%s4980_s3 + $0x228] sm:$0xff]  ;;  %v957_v18 = vld [vmem:[%s4980_s3 + $0x360] sm:$0xff] }
  0x4e   : > { %2512 = vmatprep.subr.bf16.mxu0 %v4985_v3  ;;  %v2525_v44 = vpack.c.bf16 %v918_v35, %v917_v34  ;;  %v239_v35 = vld [vmem:[%s3130_s9 + $0x80] sm:$0xff] }
  0x50   : > { %2466 = vmatpush1.bf16.msra.mxu1 %v2465_v42  ;;  %v950_v42 = vld [vmem:[%s4980_s3 + $0x328] sm:$0xff] }
  0x51   : > { %2514 = vmatpush1.bf16.msra.mxu0 %v2513_v43  ;;  %2467 = vmatprep.subr.bf16.mxu1 %v4985_v3  ;;  %v711_v43 = vrot.slane %v3348_v20, 2  ;;  %v3417_v57 = vpack.c.bf16 %v950_v42, %v949_v41  ;;  %v922_v20 = vld [vmem:[%s4980_s3 + $0x248] sm:$0xff]  ;;  %v923_v41 = vld [vmem:[%s4980_s3 + $0x250] sm:$0xff]  ;;  %v924_v42 = vld [vmem:[%s4980_s3 + $0x258] sm:$0xff] }
  0x52   : > { %2515 = vmatprep.subr.bf16.mxu0 %v4985_v3  ;;  %v2531_v34 = vpack.c.bf16 %v922_v20, %v921_v19  ;;  %v2534_v2 = vpack.c.bf16 %v924_v42, %v923_v41  ;;  %v958_v19 = vld [vmem:[%s4980_s3 + $0x368] sm:$0xff]  ;;  %v721_v20 = vrot.slane %v3504_v37, 2  ;;  %v243_v42 = vld [vmem:[%s3130_s9 + $0xa0] sm:$0x3] }
  0x54   : > { %2469 = vmatpush1.bf16.msra.mxu1 %v2468_v58  ;;  %v3421_v58 = vsel %vm468_vm1, %v407_v38, 0.0  ;;  %v299_v38 = vmul.f32 %v3150_v45, %v238_v23  ;;  %v302_v23 = vmul.f32 %v3150_v45, %v241_v1 }
  0x55   : > { %2517 = vmatpush1.bf16.msra.mxu0 %v2516_v60  ;;  %2646 = vmatprep.subr.bf16.mxu1 %v4985_v3  ;;  %v920_v60 = vld [vmem:[%s4980_s3 + $0x238] sm:$0xff]  ;;  %v603_v14 = vrot.slane %v3421_v58, 1 }
  0x56   : > { %2518 = vmatprep.subr.bf16.mxu0 %v4985_v3  ;;  %v2528_v16 = vpack.c.bf16 %v920_v60, %v919_v59  ;;  %v3540_v59 = vmax.f32 %v358_v29, 0.0  ;;  %v608_v60 = vrot.slane %v3504_v37, 1  ;;  %v360_v4 = vadd.f32 %v3156_v47, %v299_v38  ;;  %v927_v37 = vld [vmem:[%s4980_s3 + $0x270] sm:$0xff]  ;;  %v928_v38 = vld [vmem:[%s4980_s3 + $0x278] sm:$0xff] }
  0x57   : > { %1065 = vmatmul.mubr.f32.vlgmr.msra.gmra.mrb[0].mxu1 %v4983_v8  ;;  %v3498_v32 = vsel %vm589_vm2, %v601_v53, %v603_v14  ;;  %v925_v14 = vld [vmem:[%s4980_s3 + $0x260] sm:$0xff]  ;;  %v3591_v29 = vsel %vm468_vm1, %v413_v5, 0.0  ;;  %v304_v5 = vmul.f32 %v3150_v45, %v243_v42 }
  0x58   : > { %1290 = vmatmul.mubr.f32.vlgmr.msra.gmra.mrb[0].mxu0 %v3329_v7  ;;  %2662 = vmatpush1.bf16.msra.mxu1 %v3331_v10  ;;  %5088 = vst [vmem:[#allocation12_spill] sm:$0xff] %v3540_v59  ;;  %v724_v41 = vrot.slane %v3540_v59, 2 }
  0x59   : > { %2520 = vmatpush1.bf16.msra.mxu0 %v2519_v13  ;;  %1069 = vmatprep.mubr.f32.mxu1 %v3060_v9  ;;  %v3456_v13 = vsel %vm589_vm2, %v600_v52, %v601_v53  ;;  %v956_v52 = vld [vmem:[%s4980_s3 + $0x358] sm:$0xff]  ;;  %v240_v53 = vld [vmem:[%s3130_s9 + $0x88] sm:$0x3] }
  0x5a   : > { %1294 = vmatprep.mubr.f32.mxu0 %v3313_v63  ;;  %2521 = vmatprep.subr.bf16.mxu0 %v4985_v3  ;;  %v301_v12 = vmul.f32 %v3150_v45, %v240_v53 }
  0x5b   : > { %1070 = vmatmul.mubr.f32.gmra.mrb[2].mxu1 %v4983_v8  ;;  %2647 = vmatprep.subr.bf16.mxu1 %v4985_v3 }
  0x5c   : > { %1295 = vmatmul.mubr.f32.gmra.mrb[2].mxu0 %v3329_v7  ;;  %1074 = vmatprep.mubr.f32.mxu1 %v3367_v30 }
  0x5d   : > { %2258 = vmatprep.mubr.msk.f32.mxu0 %vm457_vm0, %v3362_v26  ;;  %2523 = vmatpush1.bf16.msra.mxu0 %v2522_v28  ;;  %v606_v28 = vrot.slane %v3451_v11, 1 }
  0x5e   : > { %2663 = vmatpush1.bf16.msra.mxu1 %v3381_v36  ;;  %2524 = vmatprep.subr.bf16.mxu0 %v4985_v3 }
  0x5f   : > { %2242 = vmatmul.mubr.msk.f32.gmra.mrb[4].mxu1 %vm457_vm0, %v3175_v56  ;;  %2648 = vmatprep.subr.bf16.mxu1 %v4985_v3  ;;  %v3448_v56 = vsel %vm702_vm3, %v709_v31, %v711_v43  ;;  %v3495_v31 = vsel %vm702_vm3, %v713_v0, %v714_v6  ;;  %v955_v43 = vld [vmem:[%s4980_s3 + $0x350] sm:$0xff]  ;;  %v300_v0 = vmul.f32 %v3150_v45, %v239_v35  ;;  %v242_v35 = vld [vmem:[%s3130_s9 + $0x98] sm:$0xff] }
  0x60   : > { %1300 = vmatmul.mubr.f32.gmra.mrb[4].mxu0 %v3407_v50  ;;  %1079 = vmatprep.mubr.f32.mxu1 %v3410_v51  ;;  %v3584_v24 = vsel %vm589_vm2, %v606_v28, %v608_v60 }
  0x61   : > { %1304 = vmatprep.mubr.f32.mxu0 %v3371_v33  ;;  %2526 = vmatpush1.bf16.msra.mxu0 %v2525_v44  ;;  %v3523_v44 = vmax.f32 %v357_v22, 0.0  ;;  %v611_v22 = vrot.slane %v3540_v59, 1  ;;  %v361_v25 = vadd.f32 %v3156_v47, %v300_v0  ;;  %v613_v0 = vrot.slane %v3591_v29, 1 }
  0x62   : > { %2664 = vmatpush1.bf16.msra.mxu1 %v3417_v57  ;;  %2527 = vmatprep.subr.bf16.mxu0 %v4985_v3 }
  0x63   : > { %1080 = vmatmul.mubr.f32.gmra.mrb[6].mxu1 %v3313_v63  ;;  %2649 = vmatprep.subr.bf16.mxu1 %v4985_v3  ;;  %v716_v63 = vrot.slane %v3421_v58, 2  ;;  %5087 = vst [vmem:[#allocation11_spill] sm:$0xff] %v3523_v44  ;;  %v3538_v58 = vsel %vm589_vm2, %v605_v27, %v606_v28  ;;  %v3547_v61 = vsel %vm457_vm0, %v3523_v44, 0.0  ;;  %v3587_v27 = vmax.f32 %v360_v4, 0.0 }
  0x64   : > { %1305 = vmatmul.mubr.f32.gmra.mrb[6].mxu0 %v3448_v56  ;;  %1084 = vmatprep.mubr.f32.mxu1 %v3456_v13  ;;  %v610_v21 = vrot.slane %v3547_v61, 1  ;;  %v3597_v28 = vpack.c.bf16 %v958_v19, %v957_v18  ;;  %v723_v40 = vrot.slane %v3547_v61, 2  ;;  %v363_v61 = vadd.f32 %v3156_v47, %v302_v23  ;;  %v244_v18 = vld [vmem:[%s3130_s9 + $0xa8] sm:$0xff]  ;;  %v961_v19 = vld [vmem:[%s4980_s3 + $0x380] sm:$0xff] }
  0x65   : > { %2259 = vmatprep.mubr.msk.f32.mxu0 %vm457_vm0, %v3433_v62  ;;  %2529 = vmatpush1.bf16.msra.mxu0 %v2528_v16  ;;  %v3535_v54 = vsel %vm702_vm3, %v714_v6, %v716_v63  ;;  %v3554_v6 = vpack.c.bf16 %v956_v52, %v955_v43  ;;  %v3565_v16 = vsel %vm702_vm3, %v718_v46, %v719_v49  ;;  %v959_v43 = vld [vmem:[%s4980_s3 + $0x370] sm:$0xff]  ;;  %v960_v46 = vld [vmem:[%s4980_s3 + $0x378] sm:$0xff]  ;;  %v3629_v60 = vsel %vm457_vm0, %v3587_v27, 0.0 }
  0x66   : > { %2665 = vmatpush1.bf16.msra.mxu1 %v3466_v17  ;;  %2530 = vmatprep.subr.bf16.mxu0 %v4985_v3  ;;  %v2537_v63 = vpack.c.bf16 %v926_v15, %v925_v14  ;;  %5089 = vst [vmem:[#allocation13_spill] sm:$0xff] %v3587_v27  ;;  %5090 = vst [vmem:[#allocation14_spill] sm:$0xff] %v3597_v28  ;;  %v3621_v52 = vsel %vm702_vm3, %v719_v49, %v721_v20  ;;  %v3634_v1 = vmax.f32 %v361_v25, 0.0  ;;  %v929_v14 = vld [vmem:[%s4980_s3 + $0x280] sm:$0xff]  ;;  %v930_v15 = vld [vmem:[%s4980_s3 + $0x288] sm:$0xff] }
  0x67   : > { %2243 = vmatmul.mubr.msk.f32.gmra.mrb[8].mxu1 %vm457_vm0, %v3362_v26  ;;  %2650 = vmatprep.subr.bf16.mxu1 %v4985_v3  ;;  %v3624_v53 = vsel %vm589_vm2, %v610_v21, %v611_v22  ;;  %v303_v49 = vmul.f32 %v3150_v45, %v242_v35  ;;  %v962_v20 = vld [vmem:[%s4980_s3 + $0x388] sm:$0xff]  ;;  %v3660_v21 = vsel %vm702_vm3, %v723_v40, %v724_v41  ;;  %v726_v23 = vrot.slane %v3591_v29, 2 }
  0x68   : > { %1310 = vmatmul.mubr.f32.gmra.mrb[8].mxu0 %v3495_v31  ;;  %1089 = vmatprep.mubr.f32.mxu1 %v3498_v32  ;;  %5091 = vst [vmem:[#allocation15_spill] sm:$0xff] %v3624_v53  ;;  %5092 = vst [vmem:[#allocation16_spill] sm:$0xff] %v3634_v1  ;;  %v615_v25 = vrot.slane %v3629_v60, 1  ;;  %v616_v35 = vrot.slane %v3634_v1, 1  ;;  %v2543_v40 = vpack.c.bf16 %v930_v15, %v929_v14 }
  0x69   : > { %1314 = vmatprep.mubr.f32.mxu0 %v3451_v11  ;;  %2532 = vmatpush1.bf16.msra.mxu0 %v2531_v34  ;;  %v362_v34 = vadd.f32 %v3156_v47, %v301_v12  ;;  %v3640_v12 = vpack.c.bf16 %v960_v46, %v959_v43  ;;  %v305_v42 = vmul.f32 %v3150_v45, %v244_v18  ;;  %v931_v46 = vld [vmem:[%s4980_s3 + $0x290] sm:$0xff] }
  0x6a   : > { %2666 = vmatpush1.bf16.msra.mxu1 %v3508_v39  ;;  %2533 = vmatprep.subr.bf16.mxu0 %v4985_v3  ;;  %v365_v43 = vadd.f32 %v3156_v47, %v304_v5  ;;  %v3706_v5 = vsel %vm702_vm3, %v724_v41, %v726_v23  ;;  %v3717_v18 = vsel %vm589_vm2, %v615_v25, %v616_v35  ;;  %v933_v25 = vld [vmem:[%s4980_s3 + $0x2a0] sm:$0xff] }
  0x6b   : > { %1090 = vmatmul.mubr.f32.gmra.mrb[10].mxu1 %v3371_v33  ;;  %2651 = vmatprep.subr.bf16.mxu1 %v4985_v3  ;;  %v416_v4 = vmax.f32 %v362_v34, 0.0  ;;  %5093 = vst [vmem:[#allocation17_spill] sm:$0xff] %v3640_v12  ;;  %v3670_v34 = vsel %vm589_vm2, %v611_v22, %v613_v0  ;;  %v3683_v22 = vpack.c.bf16 %v962_v20, %v961_v19  ;;  %v728_v0 = vrot.slane %v3629_v60, 2 }
  0x6c   : > { %1315 = vmatmul.mubr.f32.gmra.mrb[10].mxu0 %v3535_v54  ;;  %1094 = vmatprep.mubr.f32.mxu1 %v3538_v58  ;;  %5094 = vst [vmem:[#allocation18_spill] sm:$0xff] %v3670_v34  ;;  %5096 = vst [vmem:[#allocation20_spill] sm:$0xff] %v3706_v5  ;;  %v729_v60 = vrot.slane %v3634_v1, 2  ;;  %v366_v23 = vadd.f32 %v3156_v47, %v305_v42  ;;  %v419_v8 = vmax.f32 %v365_v43, 0.0  ;;  %v966_v42 = vld [vmem:[%s4980_s3 + $0x3a8] sm:$0xff] }
  0x6d   : > { %2260 = vmatprep.mubr.msk.f32.mxu0 %vm457_vm0, %v3523_v44  ;;  %2535 = vmatpush1.bf16.msra.mxu0 %v2534_v2  ;;  %v2540_v2 = vpack.c.bf16 %v928_v38, %v927_v37  ;;  %v364_v37 = vadd.f32 %v3156_v47, %v303_v49  ;;  %v245_v38 = vld [vmem:[%s3130_s9 + $0xb0] sm:$0xff]  ;;  %v3677_v29 = vsel %vm468_vm1, %v416_v4, 0.0  ;;  %5095 = vst [vmem:[#allocation19_spill] sm:$0xff] %v3683_v22  ;;  %v246_v49 = vld [vmem:[%s3130_s9 + $0xb8] sm:$0x3]  ;;  %5097 = vst [vmem:[#allocation21_spill] sm:$0xff] %v3717_v18 }
  0x6e   : > { %2667 = vmatpush1.bf16.msra.mxu1 %v3554_v6  ;;  %2536 = vmatprep.subr.bf16.mxu0 %v4985_v3  ;;  %v964_v4 = vld [vmem:[%s4980_s3 + $0x398] sm:$0xff]  ;;  %v306_v15 = vmul.f32 %v3150_v45, %v245_v38  ;;  %v618_v19 = vrot.slane %v3677_v29, 1  ;;  %v5098_v38 = vmov 0.0|0.0   ;;  %v3745_v43 = vsel %vm702_vm3, %v728_v0, %v729_v60 }
  0x6f   : > { %2244 = vmatmul.mubr.msk.f32.gmra.mrb[12].mxu1 %vm457_vm0, %v3433_v62  ;;  %2652 = vmatprep.subr.bf16.mxu1 %v4985_v3  ;;  %v3720_v20 = vmax.f32 %v364_v37, 0.0  ;;  %v934_v37 = vld [vmem:[%s4980_s3 + $0x2a8] sm:$0xff]  ;;  %5100 = vst [vmem:[#allocation23_spill] sm:$0xff] %v3745_v43 }
  0x70   : > { %1320 = vmatmul.mubr.f32.gmra.mrb[12].mxu0 %v3565_v16  ;;  %1099 = vmatprep.mubr.f32.mxu1 %v3584_v24  ;;  %v2549_v0 = vpack.c.bf16 %v934_v37, %v933_v25  ;;  %v968_v25 = vld [vmem:[%s4980_s3 + $0x3b8] sm:$0xff] }
  0x71   : > { %1324 = vmatprep.mubr.f32.mxu0 %v3540_v59  ;;  %2538 = vmatpush1.bf16.msra.mxu0 %v2537_v63  ;;  %v3664_v63 = vmax.f32 %v363_v61, 0.0  ;;  %v932_v61 = vld [vmem:[%s4980_s3 + $0x298] sm:$0xff]  ;;  %v734_v37 = vrot.slane %v3720_v20, 2 }
  0x72   : > { %2668 = vmatpush1.bf16.msra.mxu1 %v3597_v28  ;;  %2539 = vmatprep.subr.bf16.mxu0 %v4985_v3  ;;  %v2546_v41 = vpack.c.bf16 %v932_v61, %v931_v46  ;;  %v367_v61 = vadd.f32 %v3156_v47, %v306_v15  ;;  %v3763_v15 = vsel %vm468_vm1, %v419_v8, 0.0 }
  0x73   : > { %1100 = vmatmul.mubr.f32.gmra.mrb[14].mxu1 %v3451_v11  ;;  %2653 = vmatprep.subr.bf16.mxu1 %v4985_v3  ;;  %v3712_v14 = vsel %vm457_vm0, %v3664_v63, 0.0  ;;  %v3759_v11 = vmax.f32 %v366_v23, 0.0  ;;  %v967_v23 = vld [vmem:[%s4980_s3 + $0x3b0] sm:$0xff]  ;;  %v623_v33 = vrot.slane %v3763_v15, 1 }
  0x74   : > { %1325 = vmatmul.mubr.f32.gmra.mrb[14].mxu0 %v3621_v52  ;;  %1104 = vmatprep.mubr.f32.mxu1 %v3624_v53  ;;  %v620_v46 = vrot.slane %v3712_v14, 1 }
  0x75   : > { %2261 = vmatprep.mubr.msk.f32.mxu0 %vm457_vm0, %v3587_v27  ;;  %2541 = vmatpush1.bf16.msra.mxu0 %v2540_v2  ;;  %v963_v2 = vld [vmem:[%s4980_s3 + $0x390] sm:$0xff] }
  0x76   : > { %2669 = vmatpush1.bf16.msra.mxu1 %v3640_v12  ;;  %2542 = vmatprep.subr.bf16.mxu0 %v4985_v3  ;;  %v3726_v7 = vpack.c.bf16 %v964_v4, %v963_v2  ;;  %v3754_v2 = vsel %vm589_vm2, %v616_v35, %v618_v19  ;;  %v731_v4 = vrot.slane %v3677_v29, 2  ;;  %v935_v29 = vld [vmem:[%s4980_s3 + $0x2b0] sm:$0xff]  ;;  %v936_v19 = vld [vmem:[%s4980_s3 + $0x2b8] sm:$0xff] }
  0x77   : > { %2245 = vmatmul.mubr.msk.f32.gmra.mrb[16].mxu1 %vm457_vm0, %v3523_v44  ;;  %2654 = vmatprep.subr.bf16.mxu1 %v4985_v3  ;;  %v307_v3 = vmul.f32 %v3150_v45, %v246_v49  ;;  %v247_v49 = vld [vmem:[%s3130_s9 + $0xc0] sm:$0xff]  ;;  %5101 = vst [vmem:[#allocation24_spill] sm:$0xff] %v3754_v2  ;;  %v248_v44 = vld [vmem:[%s3130_s9 + $0xc8] sm:$0xff] }
  0x78   : > { %1330 = vmatmul.mubr.f32.gmra.mrb[16].mxu0 %v3660_v21  ;;  %1109 = vmatprep.mubr.f32.mxu1 %v3670_v34  ;;  %5099 = vst [vmem:[#allocation22_spill] sm:$0xff] %v3726_v7  ;;  %v308_v8 = vmul.f32 %v3150_v45, %v247_v49  ;;  %v3802_v49 = vsel %vm702_vm3, %v729_v60, %v731_v4  ;;  %v937_v60 = vld [vmem:[%s4980_s3 + $0x2c0] sm:$0xff]  ;;  %v250_v4 = vld [vmem:[%s3130_s9 + $0xd8] sm:$0xff] }
  0x79   : > { %1334 = vmatprep.mubr.f32.mxu0 %v3634_v1  ;;  %2544 = vmatpush1.bf16.msra.mxu0 %v2543_v40  ;;  %v965_v40 = vld [vmem:[%s4980_s3 + $0x3a0] sm:$0xff]  ;;  %v368_v62 = vadd.f32 %v3156_v47, %v307_v3  ;;  %v733_v3 = vrot.slane %v3712_v14, 2  ;;  %v3792_v14 = vmax.f32 %v367_v61, 0.0  ;;  %5103 = vst [vmem:[#allocation26_spill] sm:$0xff] %v3802_v49  ;;  %v2552_v61 = vpack.c.bf16 %v936_v19, %v935_v29  ;;  %v970_v29 = vld [vmem:[%s4980_s3 + $0x3c8] sm:$0xff] }
  0x7a   : > { %2670 = vmatpush1.bf16.msra.mxu1 %v3683_v22  ;;  %2545 = vmatprep.subr.bf16.mxu0 %v5098_v38  ;;  %v3768_v35 = vpack.c.bf16 %v966_v42, %v965_v40  ;;  %v3797_v40 = vsel %vm457_vm0, %v3759_v11, 0.0  ;;  %v309_v42 = vmul.f32 %v3150_v45, %v248_v44  ;;  %v3811_v44 = vpack.c.bf16 %v968_v25, %v967_v23 }
  0x7b   : > { %1110 = vmatmul.mubr.f32.gmra.mrb[18].mxu1 %v3540_v59  ;;  %2655 = vmatprep.subr.bf16.mxu1 %v5098_v38  ;;  %v621_v59 = vrot.slane %v3720_v20, 1  ;;  %v422_v26 = vmax.f32 %v368_v62, 0.0  ;;  %v369_v62 = vadd.f32 %v3156_v47, %v308_v8  ;;  %v736_v19 = vrot.slane %v3763_v15, 2 }
  0x7c   : > { %1335 = vmatmul.mubr.f32.gmra.mrb[18].mxu0 %v3706_v5  ;;  %1114 = vmatprep.mubr.f32.mxu1 %v3717_v18  ;;  %5102 = vst [vmem:[#allocation25_spill] sm:$0xff] %v3768_v35  ;;  %5104 = vst [vmem:[#allocation27_spill] sm:$0xff] %v3811_v44  ;;  %v625_v8 = vrot.slane %v3797_v40, 1  ;;  %v370_v23 = vadd.f32 %v3156_v47, %v309_v42  ;;  %v3839_v25 = vsel %vm702_vm3, %v733_v3, %v734_v37  ;;  %v254_v18 = vld [vmem:[%s3130_s9 + $0xf8] sm:$0xff] }
  0x7d   : > { %2262 = vmatprep.mubr.msk.f32.mxu0 %vm457_vm0, %v3664_v63  ;;  %2547 = vmatpush1.bf16.msra.mxu0 %v2546_v41  ;;  %v249_v41 = vld [vmem:[%s3130_s9 + $0xd0] sm:$0x3]  ;;  %5105 = vst [vmem:[#allocation28_spill] sm:$0xff] %v3839_v25  ;;  %v3846_v15 = vsel %vm468_vm1, %v422_v26, 0.0  ;;  %v940_v26 = vld [vmem:[%s4980_s3 + $0x2d8] sm:$0xff] }
  0x7e   : > { %2671 = vmatpush1.bf16.msra.mxu1 %v3726_v7  ;;  %2548 = vmatprep.subr.bf16.mxu0 %v5098_v38  ;;  %v310_v9 = vmul.f32 %v3150_v45, %v249_v41  ;;  %v626_v41 = vrot.slane %v3792_v14, 1  ;;  %v311_v7 = vmul.f32 %v3150_v45, %v250_v4  ;;  %v739_v4 = vrot.slane %v3792_v14, 2 }
  0x7f   : > { %2246 = vmatmul.mubr.msk.f32.gmra.mrb[20].mxu1 %vm457_vm0, %v3587_v27  ;;  %2656 = vmatprep.subr.bf16.mxu1 %v5098_v38  ;;  %v3805_v27 = vsel %vm589_vm2, %v620_v46, %v621_v59  ;;  %v938_v46 = vld [vmem:[%s4980_s3 + $0x2c8] sm:$0xff] }
  0x80   : > { %1340 = vmatmul.mubr.f32.gmra.mrb[20].mxu0 %v3745_v43  ;;  %1119 = vmatprep.mubr.f32.mxu1 %v3754_v2  ;;  %v371_v42 = vadd.f32 %v3156_v47, %v310_v9  ;;  %v251_v2 = vld [vmem:[%s3130_s9 + $0xe0] sm:$0xff]  ;;  %v3864_v9 = vmax.f32 %v369_v62, 0.0  ;;  %v3878_v62 = vsel %vm702_vm3, %v734_v37, %v736_v19  ;;  %v372_v19 = vadd.f32 %v3156_v47, %v311_v7  ;;  %v974_v7 = vld [vmem:[%s4980_s3 + $0x3e8] sm:$0xff] }
  0x81   : > { %1344 = vmatprep.mubr.f32.mxu0 %v3720_v20  ;;  %2550 = vmatpush1.bf16.msra.mxu0 %v2549_v0  ;;  %v969_v0 = vld [vmem:[%s4980_s3 + $0x3c0] sm:$0xff]  ;;  %5107 = vst [vmem:[#allocation30_spill] sm:$0xff] %v3878_v62 }
  0x82   : > { %2672 = vmatpush1.bf16.msra.mxu1 %v3768_v35  ;;  %2551 = vmatprep.subr.bf16.mxu0 %v5098_v38  ;;  %v2555_v35 = vpack.c.bf16 %v938_v46, %v937_v60  ;;  %v3853_v3 = vpack.c.bf16 %v970_v29, %v969_v0  ;;  %v971_v60 = vld [vmem:[%s4980_s3 + $0x3d0] sm:$0xff]  ;;  %v972_v46 = vld [vmem:[%s4980_s3 + $0x3d8] sm:$0xff]  ;;  %v3884_v0 = vmax.f32 %v370_v23, 0.0  ;;  %v628_v29 = vrot.slane %v3846_v15, 1 }
  0x83   : > { %1120 = vmatmul.mubr.f32.gmra.mrb[22].mxu1 %v3634_v1  ;;  %2657 = vmatprep.subr.bf16.mxu1 %v5098_v38  ;;  %v3842_v1 = vsel %vm589_vm2, %v621_v59, %v623_v33  ;;  %v939_v33 = vld [vmem:[%s4980_s3 + $0x2d0] sm:$0xff]  ;;  %v738_v59 = vrot.slane %v3797_v40, 2  ;;  %v3881_v40 = vsel %vm589_vm2, %v625_v8, %v626_v41  ;;  %v425_v8 = vmax.f32 %v371_v42, 0.0 }
  0x84   : > { %1345 = vmatmul.mubr.f32.gmra.mrb[22].mxu0 %v3802_v49  ;;  %1124 = vmatprep.mubr.f32.mxu1 %v3805_v27  ;;  %5106 = vst [vmem:[#allocation29_spill] sm:$0xff] %v3853_v3  ;;  %v2558_v37 = vpack.c.bf16 %v940_v26, %v939_v33  ;;  %v3898_v23 = vpack.c.bf16 %v972_v46, %v971_v60  ;;  %v941_v49 = vld [vmem:[%s4980_s3 + $0x2e0] sm:$0xff]  ;;  %v741_v42 = vrot.slane %v3846_v15, 2  ;;  %v631_v26 = vrot.slane %v3884_v0, 1  ;;  %v253_v46 = vld [vmem:[%s3130_s9 + $0xf0] sm:$0xff] }
  0x85   : > { %2263 = vmatprep.mubr.msk.f32.mxu0 %vm457_vm0, %v3759_v11  ;;  %2553 = vmatpush1.bf16.msra.mxu0 %v2552_v61  ;;  %v252_v61 = vld [vmem:[%s3130_s9 + $0xe8] sm:$0x3]  ;;  %v3934_v15 = vsel %vm468_vm1, %v425_v8, 0.0 }
  0x86   : > { %2673 = vmatpush1.bf16.msra.mxu1 %v3811_v44  ;;  %2554 = vmatprep.subr.bf16.mxu0 %v5098_v38  ;;  %v3891_v44 = vsel %vm457_vm0, %v3864_v9, 0.0  ;;  %v313_v22 = vmul.f32 %v3150_v45, %v252_v61  ;;  %5108 = vst [vmem:[#allocation31_spill] sm:$0xff] %v3898_v23  ;;  %v3926_v61 = vsel %vm589_vm2, %v626_v41, %v628_v29  ;;  %v255_v29 = vld [vmem:[%s3130_s9 + $0x100] sm:$0x3] }
  0x87   : > { %2247 = vmatmul.mubr.msk.f32.gmra.mrb[24].mxu1 %vm457_vm0, %v3664_v63  ;;  %2658 = vmatprep.subr.bf16.mxu1 %v5098_v38  ;;  %v630_v33 = vrot.slane %v3891_v44, 1  ;;  %v3964_v8 = vsel %vm702_vm3, %v739_v4, %v741_v42  ;;  %v633_v42 = vrot.slane %v3934_v15, 1 }
  0x88   : > { %1350 = vmatmul.mubr.f32.gmra.mrb[24].mxu0 %v3839_v25  ;;  %1129 = vmatprep.mubr.f32.mxu1 %v3842_v1  ;;  %v312_v25 = vmul.f32 %v3150_v45, %v251_v2  ;;  %v942_v2 = vld [vmem:[%s4980_s3 + $0x2e8] sm:$0xff]  ;;  %v973_v45 = vld [vmem:[%s4980_s3 + $0x3e0] sm:$0xff]  ;;  %5111 = vst [vmem:[#allocation34_spill] sm:$0xff] %v3964_v8 }
  0x89   : > { %1354 = vmatprep.mubr.f32.mxu0 %v3792_v14  ;;  %2556 = vmatpush1.bf16.msra.mxu0 %v2555_v35  ;;  %v3917_v35 = vsel %vm702_vm3, %v738_v59, %v739_v4  ;;  %v2561_v59 = vpack.c.bf16 %v942_v2, %v941_v49  ;;  %v3940_v41 = vpack.c.bf16 %v974_v7, %v973_v45  ;;  %v944_v49 = vld [vmem:[%s4980_s3 + $0x2f8] sm:$0xff]  ;;  %v3975_v45 = vld [vmem:[%s4978_s1] ss:$0 sm:$0xff]  ;;  %v978_v4 = vld [vmem:[%s4980_s3 + $0x408] sm:$0xff] }
  0x8a   : > { %2674 = vmatpush1.bf16.msra.mxu1 %v3853_v3  ;;  %2557 = vmatprep.subr.bf16.mxu0 %v5098_v38  ;;  %5109 = vst [vmem:[#allocation32_spill] sm:$0xff] %v3917_v35  ;;  %v373_v60 = vadd.f32 %v3156_v47, %v312_v25  ;;  %v3930_v3 = vmax.f32 %v372_v19, 0.0  ;;  %v943_v25 = vld [vmem:[%s4980_s3 + $0x2f0] sm:$0xff]  ;;  %v976_v19 = vld [vmem:[%s4980_s3 + $0x3f8] sm:$0xff]  ;;  %v314_v7 = vmul.f32 %v3975_v45, %v253_v46 }
  0x8b   : > { %1130 = vmatmul.mubr.f32.gmra.mrb[26].mxu1 %v3720_v20  ;;  %2659 = vmatprep.subr.bf16.mxu1 %v5098_v38  ;;  %5110 = vst [vmem:[#allocation33_spill] sm:$0xff] %v3940_v41  ;;  %v2564_v12 = vpack.c.bf16 %v944_v49, %v943_v25  ;;  %v316_v43 = vmul.f32 %v3975_v45, %v255_v29  ;;  %v256_v49 = vld [vmem:[%s3130_s9 + $0x108] sm:$0xff] }
  0x8c   : > { %1355 = vmatmul.mubr.f32.gmra.mrb[26].mxu0 %v3878_v62  ;;  %1134 = vmatprep.mubr.f32.mxu1 %v3881_v40  ;;  %v374_v62 = vadd.f32 %v3156_v47, %v313_v22  ;;  %v743_v47 = vrot.slane %v3891_v44, 2  ;;  %v744_v22 = vrot.slane %v3884_v0, 2  ;;  %v3967_v44 = vsel %vm589_vm2, %v630_v33, %v631_v26 }
  0x8d   : > { %2264 = vmatprep.mubr.msk.f32.mxu0 %vm457_vm0, %v3864_v9  ;;  %2559 = vmatpush1.bf16.msra.mxu0 %v2558_v37  ;;  %v975_v37 = vld [vmem:[%s4980_s3 + $0x3f0] sm:$0xff]  ;;  %v514_v2 = vsel %vm457_vm0, %v3930_v3, 0.0  ;;  %v3986_v33 = vmax.f32 %v373_v60, 0.0 }
  0x8e   : > { %2675 = vmatpush1.bf16.msra.mxu1 %v3898_v23  ;;  %2560 = vmatprep.subr.bf16.mxu0 %v5098_v38  ;;  %v977_v23 = vld [vmem:[%s4980_s3 + $0x400] sm:$0xff]  ;;  %v428_v46 = vmax.f32 %v374_v62, 0.0  ;;  %v3992_v34 = vpack.c.bf16 %v976_v19, %v975_v37  ;;  %v635_v62 = vrot.slane %v514_v2, 1  ;;  %v257_v19 = vld [vmem:[%s3130_s9 + $0x110] sm:$0xff] }
  0x8f   : > { %2248 = vmatmul.mubr.msk.f32.gmra.mrb[28].mxu1 %vm457_vm0, %v3759_v11  ;;  %2660 = vmatprep.subr.bf16.mxu1 %v5098_v38  ;;  %5112 = vst [vmem:[#allocation35_spill] sm:$0xff] %v3986_v33  ;;  %v3996_v60 = vpack.c.bf16 %v978_v4, %v977_v23  ;;  %v4014_v23 = vsel %vm589_vm2, %v631_v26, %v633_v42  ;;  %v636_v29 = vrot.slane %v3986_v33, 1 }
  0x90   : > { %1360 = vmatmul.mubr.f32.gmra.mrb[28].mxu0 %v3917_v35  ;;  %1139 = vmatprep.mubr.f32.mxu1 %v3926_v61  ;;  %v315_v35 = vmul.f32 %v3975_v45, %v254_v18  ;;  %5113 = vst [vmem:[#allocation36_spill] sm:$0xff] %v3992_v34  ;;  %v4001_v18 = vsel %vm702_vm3, %v743_v47, %v744_v22  ;;  %v746_v47 = vrot.slane %v3934_v15, 2  ;;  %v516_v4 = vsel %vm468_vm1, %v428_v46, 0.0  ;;  %v258_v15 = vld [vmem:[%s3130_s9 + $0x118] sm:$0x3] }
  0x91   : > { %1364 = vmatprep.mubr.f32.mxu0 %v3884_v0  ;;  %2562 = vmatpush1.bf16.msra.mxu0 %v2561_v59  ;;  %5114 = vst [vmem:[#allocation37_spill] sm:$0xff] %v4001_v18  ;;  %v4006_v59 = vld [vmem:[%s4979_s2] ss:$0 sm:$0xff]  ;;  %v317_v26 = vmul.f32 %v3975_v45, %v256_v49  ;;  %v318_v42 = vmul.f32 %v3975_v45, %v257_v19 }
  0x92   : > { %2676 = vmatpush1.bf16.msra.mxu1 %v3940_v41  ;;  %2563 = vmatprep.subr.bf16.mxu0 %v5098_v38  ;;  %v375_v25 = vadd.f32 %v4006_v59, %v314_v7  ;;  %v376_v37 = vadd.f32 %v4006_v59, %v315_v35  ;;  %v377_v7 = vadd.f32 %v4006_v59, %v316_v43  ;;  %v748_v43 = vrot.slane %v514_v2, 2 }
  0x93   : > { %1140 = vmatmul.mubr.f32.gmra.mrb[30].mxu1 %v3792_v14  ;;  %2661 = vmatprep.subr.bf16.mxu1 %v5098_v38  ;;  %v749_v35 = vrot.slane %v3986_v33, 2  ;;  %v4039_v46 = vsel %vm702_vm3, %v744_v22, %v746_v47  ;;  %v4042_v49 = vsel %vm589_vm2, %v635_v62, %v636_v29  ;;  %v378_v19 = vadd.f32 %v4006_v59, %v317_v26  ;;  %v259_v47 = vld [vmem:[%s3130_s9 + $0x120] sm:$0xff] }
  0x94   : > { %1365 = vmatmul.mubr.f32.gmra.mrb[30].mxu0 %v3964_v8  ;;  %1144 = vmatprep.mubr.f32.mxu1 %v3967_v44  ;;  %5116 = vst [vmem:[#allocation39_spill] sm:$0xff] %v4039_v46  ;;  %v4044_v41 = vmax.f32 %v376_v37, 0.0  ;;  %v379_v62 = vadd.f32 %v4006_v59, %v318_v42  ;;  %v320_v28 = vmul.f32 %v3975_v45, %v259_v47 }
  0x95   : > { %2265 = vmatprep.mubr.msk.f32.mxu0 %vm457_vm0, %v3930_v3  ;;  %2565 = vmatpush1.bf16.msra.mxu0 %v2564_v12  ;;  %v4033_v12 = vmax.f32 %v375_v25, 0.0  ;;  %v431_v25 = vmax.f32 %v377_v7, 0.0  ;;  %v4055_v22 = vsel %vm702_vm3, %v748_v43, %v749_v35  ;;  %v751_v7 = vrot.slane %v516_v4, 2 }
  0x96   : > { %2677 = vmatpush1.bf16.msra.mxu1 %v3992_v34  ;;  %2566 = vmatprep.subr.bf16.mxu0 %v5098_v38  ;;  %v638_v34 = vrot.slane %v516_v4, 1  ;;  %5117 = vst [vmem:[#allocation40_spill] sm:$0xff] %v4044_v41  ;;  %5118 = vst [vmem:[#allocation41_spill] sm:$0xff] %v4055_v22  ;;  %v4073_v42 = vmax.f32 %v378_v19, 0.0  ;;  %v754_v4 = vrot.slane %v4044_v41, 2  ;;  %v4080_v5 = vmax.f32 %v379_v62, 0.0 }
  0x97   : > { %2249 = vmatmul.mubr.msk.f32.gmra.mrb[32].mxu1 %vm457_vm0, %v3864_v9  ;;  %2615 = vmatprep.subr.bf16.mxu1 %v3996_v60  ;;  %5115 = vst [vmem:[#allocation38_spill] sm:$0xff] %v4033_v12  ;;  %v517_v2 = vsel %vm457_vm0, %v4033_v12, 0.0  ;;  %v519_v8 = vsel %vm468_vm1, %v431_v25, 0.0  ;;  %v4085_v25 = vsel %vm702_vm3, %v749_v35, %v751_v7 }
  0x98   : > { %1370 = vmatmul.mubr.f32.gmra.mrb[32].mxu0 %v4001_v18  ;;  %1149 = vmatprep.mubr.f32.mxu1 %v4014_v23  ;;  %v319_v18 = vmul.f32 %v3975_v45, %v258_v15  ;;  %v4063_v37 = vsel %vm589_vm2, %v636_v29, %v638_v34  ;;  %v640_v26 = vrot.slane %v517_v2, 1  ;;  %v641_v15 = vrot.slane %v4044_v41, 1  ;;  %v261_v34 = vld [vmem:[%s3130_s9 + $0x130] sm:$0x3]  ;;  %5120 = vst [vmem:[#allocation43_spill] sm:$0xff] %v4080_v5 }
  0x99   : > { %1374 = vmatprep.mubr.f32.mxu0 %v3986_v33  ;;  %5119 = vst [vmem:[#allocation42_spill] sm:$0xff] %v4063_v37  ;;  %v753_v29 = vrot.slane %v517_v2, 2  ;;  %5121 = vst [vmem:[#allocation44_spill] sm:$0xff] %v4085_v25  ;;  %v643_v47 = vrot.slane %v519_v8, 1  ;;  %v520_v2 = vsel %vm457_vm0, %v4073_v42, 0.0  ;;  %v322_v62 = vmul.f32 %v3975_v45, %v261_v34 }
  0x9a   : > { %v380_v43 = vadd.f32 %v4006_v59, %v319_v18  ;;  %v4088_v19 = vsel %vm589_vm2, %v640_v26, %v641_v15  ;;  %v645_v35 = vrot.slane %v520_v2, 1  ;;  %v646_v7 = vrot.slane %v4080_v5, 1 }
  0x9b   : > { %1150 = vmatmul.mubr.f32.gmra.mrb[34].mxu1 %v3884_v0  ;;  %5122 = vst [vmem:[#allocation45_spill] sm:$0xff] %v4088_v19  ;;  %v4107_v34 = vsel %vm589_vm2, %v641_v15, %v643_v47  ;;  %v758_v53 = vrot.slane %v520_v2, 2 }
  0x9c   : > { %1375 = vmatmul.mubr.f32.gmra.mrb[34].mxu0 %v4039_v46  ;;  %1154 = vmatprep.mubr.f32.mxu1 %v4042_v49  ;;  %v260_v46 = vld [vmem:[%s3130_s9 + $0x128] sm:$0xff]  ;;  %5124 = vst [vmem:[#allocation47_spill] sm:$0xff] %v4107_v34 }
  0x9d   : > { %2266 = vmatprep.mubr.msk.f32.mxu0 %vm457_vm0, %v4033_v12  ;;  %v321_v18 = vmul.f32 %v3975_v45, %v260_v46  ;;  %v381_v46 = vadd.f32 %v4006_v59, %v320_v28  ;;  %v756_v28 = vrot.slane %v519_v8, 2  ;;  %v4123_v8 = vsel %vm589_vm2, %v645_v35, %v646_v7 }
  0x9e   : > { %5126 = vst [vmem:[#allocation49_spill] sm:$0xff] %v4123_v8 }
  0x9f   : > { %2250 = vmatmul.mubr.msk.f32.gmra.mrb[36].mxu1 %vm457_vm0, %v3930_v3  ;;  %v382_v26 = vadd.f32 %v4006_v59, %v321_v18  ;;  %v4117_v18 = vmax.f32 %v381_v46, 0.0 }
  0xa0   : > { %1380 = vmatmul.mubr.f32.gmra.mrb[36].mxu0 %v4055_v22  ;;  %1159 = vmatprep.mubr.f32.mxu1 %v4063_v37  ;;  %v434_v22 = vmax.f32 %v380_v43, 0.0  ;;  %v4104_v43 = vsel %vm702_vm3, %v753_v29, %v754_v4  ;;  %v263_v37 = vld [vmem:[%s3130_s9 + $0x140] sm:$0xff]  ;;  %v264_v29 = vld [vmem:[%s3130_s9 + $0x148] sm:$0x3] }
  0xa1   : > { %1384 = vmatprep.mubr.f32.mxu0 %v4044_v41  ;;  %5123 = vst [vmem:[#allocation46_spill] sm:$0xff] %v4104_v43  ;;  %5125 = vst [vmem:[#allocation48_spill] sm:$0xff] %v4117_v18  ;;  %v4126_v15 = vmax.f32 %v382_v26, 0.0  ;;  %v523_v46 = vsel %vm457_vm0, %v4117_v18, 0.0  ;;  %v324_v35 = vmul.f32 %v3975_v45, %v263_v37  ;;  %v325_v26 = vmul.f32 %v3975_v45, %v264_v29 }
  0xa3   : > { %1160 = vmatmul.mubr.f32.gmra.mrb[38].mxu1 %v3986_v33  ;;  %v383_v33 = vadd.f32 %v4006_v59, %v322_v62  ;;  %v4131_v62 = vsel %vm702_vm3, %v754_v4, %v756_v28  ;;  %v650_v4 = vrot.slane %v523_v46, 1 }
  0xa4   : > { %1385 = vmatmul.mubr.f32.gmra.mrb[38].mxu0 %v4085_v25  ;;  %1164 = vmatprep.mubr.f32.mxu1 %v4088_v19  ;;  %v262_v25 = vld [vmem:[%s3130_s9 + $0x138] sm:$0xff]  ;;  %v522_v19 = vsel %vm468_vm1, %v434_v22, 0.0  ;;  %v759_v22 = vrot.slane %v4080_v5, 2  ;;  %5127 = vst [vmem:[#allocation50_spill] sm:$0xff] %v4131_v62 }
  0xa5   : > { %2267 = vmatprep.mubr.msk.f32.mxu0 %vm457_vm0, %v4073_v42  ;;  %v323_v47 = vmul.f32 %v3975_v45, %v262_v25  ;;  %v648_v2 = vrot.slane %v522_v19, 1  ;;  %v651_v25 = vrot.slane %v4126_v15, 1  ;;  %v761_v29 = vrot.slane %v522_v19, 2 }
  0xa7   : > { %2251 = vmatmul.mubr.msk.f32.gmra.mrb[40].mxu1 %vm457_vm0, %v4033_v12  ;;  %v384_v28 = vadd.f32 %v4006_v59, %v323_v47  ;;  %v4150_v37 = vsel %vm589_vm2, %v646_v7, %v648_v2  ;;  %v266_v47 = vld [vmem:[%s3130_s9 + $0x158] sm:$0xff]  ;;  %v763_v12 = vrot.slane %v523_v46, 2  ;;  %v4165_v19 = vsel %vm589_vm2, %v650_v4, %v651_v25 }
  0xa8   : > { %1390 = vmatmul.mubr.f32.gmra.mrb[40].mxu0 %v4104_v43  ;;  %1169 = vmatprep.mubr.f32.mxu1 %v4107_v34  ;;  %v437_v43 = vmax.f32 %v383_v33, 0.0  ;;  %v4147_v33 = vsel %vm702_vm3, %v758_v53, %v759_v22  ;;  %5129 = vst [vmem:[#allocation52_spill] sm:$0xff] %v4150_v37  ;;  %v386_v34 = vadd.f32 %v4006_v59, %v325_v26  ;;  %v267_v53 = vld [vmem:[%s3130_s9 + $0x160] sm:$0x3]  ;;  %5130 = vst [vmem:[#allocation53_spill] sm:$0xff] %v4165_v19 }
  0xa9   : > { %1394 = vmatprep.mubr.f32.mxu0 %v4080_v5  ;;  %5128 = vst [vmem:[#allocation51_spill] sm:$0xff] %v4147_v33  ;;  %v4167_v7 = vmax.f32 %v384_v28, 0.0 }
  0xaa   : > { %v440_v28 = vmax.f32 %v386_v34, 0.0 }
  0xab   : > { %1170 = vmatmul.mubr.f32.gmra.mrb[42].mxu1 %v4044_v41  ;;  %v265_v41 = vld [vmem:[%s3130_s9 + $0x150] sm:$0xff]  ;;  %5131 = vst [vmem:[#allocation54_spill] sm:$0xff] %v4167_v7  ;;  %v526_v4 = vsel %vm457_vm0, %v4167_v7, 0.0 }
  0xac   : > { %1395 = vmatmul.mubr.f32.gmra.mrb[42].mxu0 %v4131_v62  ;;  %1174 = vmatprep.mubr.f32.mxu1 %v4123_v8  ;;  %v385_v62 = vadd.f32 %v4006_v59, %v324_v35  ;;  %v525_v8 = vsel %vm468_vm1, %v437_v43, 0.0  ;;  %v764_v43 = vrot.slane %v4126_v15, 2  ;;  %v326_v2 = vmul.f32 %v3975_v45, %v265_v41 }
  0xad   : > { %2268 = vmatprep.mubr.msk.f32.mxu0 %vm457_vm0, %v4117_v18  ;;  %v4173_v35 = vsel %vm702_vm3, %v759_v22, %v761_v29  ;;  %v653_v46 = vrot.slane %v525_v8, 1  ;;  %v766_v22 = vrot.slane %v525_v8, 2  ;;  %v268_v29 = vld [vmem:[%s3130_s9 + $0x168] sm:$0xff] }
  0xae   : > { %5132 = vst [vmem:[#allocation55_spill] sm:$0xff] %v4173_v35  ;;  %v4175_v26 = vmax.f32 %v385_v62, 0.0  ;;  %v4186_v41 = vsel %vm702_vm3, %v763_v12, %v764_v43  ;;  %v387_v62 = vadd.f32 %v4006_v59, %v326_v2  ;;  %v528_v12 = vsel %vm468_vm1, %v440_v28, 0.0 }
  0xaf   : > { %2252 = vmatmul.mubr.msk.f32.gmra.mrb[44].mxu1 %vm457_vm0, %v4073_v42  ;;  %5133 = vst [vmem:[#allocation56_spill] sm:$0xff] %v4186_v41  ;;  %v4194_v34 = vsel %vm589_vm2, %v651_v25, %v653_v46  ;;  %v329_v2 = vmul.f32 %v3975_v45, %v268_v29  ;;  %v658_v29 = vrot.slane %v528_v12, 1 }
  0xb0   : > { %1400 = vmatmul.mubr.f32.gmra.mrb[44].mxu0 %v4147_v33  ;;  %1179 = vmatprep.mubr.f32.mxu1 %v4150_v37  ;;  %v327_v33 = vmul.f32 %v3975_v45, %v266_v47  ;;  %v328_v37 = vmul.f32 %v3975_v45, %v267_v53  ;;  %5134 = vst [vmem:[#allocation57_spill] sm:$0xff] %v4194_v34  ;;  %v655_v47 = vrot.slane %v526_v4, 1  ;;  %v656_v53 = vrot.slane %v4175_v26, 1  ;;  %v5182_v55 = vld [vmem:[#allocation51_spill] sm:$0xff] }
  0xb1   : > { %1404 = vmatprep.mubr.f32.mxu0 %v4126_v15  ;;  %v4209_v25 = vmax.f32 %v387_v62, 0.0  ;;  %v769_v46 = vrot.slane %v4175_v26, 2 }
  0xb2   : > { %v389_v8 = vadd.f32 %v4006_v59, %v328_v37  ;;  %v4215_v37 = vsel %vm702_vm3, %v764_v43, %v766_v22  ;;  %v4238_v22 = vsel %vm589_vm2, %v656_v53, %v658_v29 }
  0xb3   : > { %1180 = vmatmul.mubr.f32.gmra.mrb[46].mxu1 %v4080_v5  ;;  %v270_v5 = vld [vmem:[%s3130_s9 + $0x178] sm:$0x3]  ;;  %5135 = vst [vmem:[#allocation58_spill] sm:$0xff] %v4215_v37  ;;  %5137 = vst [vmem:[#allocation60_spill] sm:$0xff] %v4238_v22 }
  0xb4   : > { %1405 = vmatmul.mubr.f32.gmra.mrb[46].mxu0 %v4173_v35  ;;  %1184 = vmatprep.mubr.f32.mxu1 %v4165_v19  ;;  %v388_v35 = vadd.f32 %v4006_v59, %v327_v33  ;;  %v269_v19 = vld [vmem:[%s3130_s9 + $0x170] sm:$0xff]  ;;  %v768_v33 = vrot.slane %v526_v4, 2  ;;  %v529_v4 = vsel %vm457_vm0, %v4209_v25, 0.0  ;;  %v443_v62 = vmax.f32 %v389_v8, 0.0 }
  0xb5   : > { %2269 = vmatprep.mubr.msk.f32.mxu0 %vm457_vm0, %v4167_v7  ;;  %v330_v28 = vmul.f32 %v3975_v45, %v269_v19  ;;  %v390_v19 = vadd.f32 %v4006_v59, %v329_v2  ;;  %v271_v2 = vld [vmem:[%s3130_s9 + $0x180] sm:$0xff] }
  0xb6   : > { %v4231_v43 = vsel %vm702_vm3, %v768_v33, %v769_v46 }
  0xb7   : > { %2253 = vmatmul.mubr.msk.f32.gmra.mrb[48].mxu1 %vm457_vm0, %v4117_v18  ;;  %v4218_v18 = vsel %vm589_vm2, %v655_v47, %v656_v53  ;;  %5136 = vst [vmem:[#allocation59_spill] sm:$0xff] %v4231_v43  ;;  %v660_v47 = vrot.slane %v529_v4, 1  ;;  %v773_v53 = vrot.slane %v529_v4, 2 }
  0xb8   : > { %1410 = vmatmul.mubr.f32.gmra.mrb[48].mxu0 %v4186_v41  ;;  %1189 = vmatprep.mubr.f32.mxu1 %v4194_v34  ;;  %v4220_v41 = vmax.f32 %v388_v35, 0.0  ;;  %v331_v34 = vmul.f32 %v3975_v45, %v270_v5  ;;  %v391_v35 = vadd.f32 %v4006_v59, %v330_v28  ;;  %v771_v5 = vrot.slane %v528_v12, 2 }
  0xb9   : > { %1414 = vmatprep.mubr.f32.mxu0 %v4175_v26  ;;  %v4248_v28 = vmax.f32 %v390_v19, 0.0 }
  0xba   : > { %v661_v8 = vrot.slane %v4220_v41, 1  ;;  %v392_v33 = vadd.f32 %v4006_v59, %v331_v34  ;;  %v774_v12 = vrot.slane %v4220_v41, 2  ;;  %v4253_v29 = vmax.f32 %v391_v35, 0.0 }
  0xbb   : > { %1190 = vmatmul.mubr.f32.gmra.mrb[50].mxu1 %v4126_v15  ;;  %v4258_v34 = vsel %vm702_vm3, %v769_v46, %v771_v5 }
  0xbc   : > { %1415 = vmatmul.mubr.f32.gmra.mrb[50].mxu0 %v4215_v37  ;;  %1194 = vmatprep.mubr.f32.mxu1 %v4218_v18  ;;  %v531_v37 = vsel %vm468_vm1, %v443_v62, 0.0  ;;  %v332_v62 = vmul.f32 %v3975_v45, %v271_v2  ;;  %5138 = vst [vmem:[#allocation61_spill] sm:$0xff] %v4258_v34  ;;  %v446_v4 = vmax.f32 %v392_v33, 0.0  ;;  %v4271_v35 = vsel %vm702_vm3, %v773_v53, %v774_v12 }
  0xbd   : > { %2270 = vmatprep.mubr.msk.f32.mxu0 %vm457_vm0, %v4209_v25  ;;  %v663_v19 = vrot.slane %v531_v37, 1  ;;  %v776_v2 = vrot.slane %v531_v37, 2  ;;  %v666_v33 = vrot.slane %v4253_v29, 1  ;;  %v779_v37 = vrot.slane %v4253_v29, 2 }
  0xbe   : > { %v393_v5 = vadd.f32 %v4006_v59, %v332_v62 }
  0xbf   : > { %2254 = vmatmul.mubr.msk.f32.gmra.mrb[52].mxu1 %vm457_vm0, %v4167_v7  ;;  %v4261_v7 = vsel %vm589_vm2, %v660_v47, %v661_v8  ;;  %v4278_v47 = vsel %vm589_vm2, %v661_v8, %v663_v19 }
  0xc0   : > { %1420 = vmatmul.mubr.f32.gmra.mrb[52].mxu0 %v4231_v43  ;;  %1199 = vmatprep.mubr.f32.mxu1 %v4238_v22  ;;  %5139 = vst [vmem:[#allocation62_spill] sm:$0xff] %v4261_v7  ;;  %v532_v43 = vsel %vm457_vm0, %v4248_v28, 0.0  ;;  %v272_v22 = vld [vmem:[%s3130_s9 + $0x188] sm:$0xff]  ;;  %v4289_v53 = vmax.f32 %v393_v5, 0.0 }
  0xc1   : > { %1424 = vmatprep.mubr.f32.mxu0 %v4220_v41  ;;  %v665_v46 = vrot.slane %v532_v43, 1  ;;  %v778_v8 = vrot.slane %v532_v43, 2 }
  0xc3   : > { %1200 = vmatmul.mubr.f32.gmra.mrb[54].mxu1 %v4175_v26  ;;  %v4297_v62 = vsel %vm589_vm2, %v665_v46, %v666_v33  ;;  %v4307_v43 = vsel %vm702_vm3, %v778_v8, %v779_v37  ;;  %v981_v8 = vld [vmem:[%s4980_s3 + $0x420] sm:$0xff] }
  0xc4   : > { %1425 = vmatmul.mubr.f32.gmra.mrb[54].mxu0 %v4258_v34  ;;  %1204 = vmatprep.mubr.f32.mxu1 %v4261_v7  ;;  %v333_v34 = vmul.f32 %v3975_v45, %v272_v22  ;;  %v534_v7 = vsel %vm468_vm1, %v446_v4, 0.0  ;;  %v4294_v22 = vsel %vm702_vm3, %v774_v12, %v776_v2  ;;  %v980_v2 = vld [vmem:[%s4980_s3 + $0x418] sm:$0xff] }
  0xc5   : > { %2271 = vmatprep.mubr.msk.f32.mxu0 %vm457_vm0, %v4248_v28  ;;  %v668_v19 = vrot.slane %v534_v7, 1  ;;  %v781_v5 = vrot.slane %v534_v7, 2  ;;  %v979_v7 = vld [vmem:[%s4980_s3 + $0x410] sm:$0xff] }
  0xc6   : > { %v394_v4 = vadd.f32 %v4006_v59, %v333_v34 }
  0xc7   : > { %2255 = vmatmul.mubr.msk.f32.gmra.mrb[56].mxu1 %vm457_vm0, %v4209_v25  ;;  %v4310_v12 = vsel %vm589_vm2, %v666_v33, %v668_v19  ;;  %v4321_v34 = vsel %vm702_vm3, %v779_v37, %v781_v5  ;;  %v2618_v33 = vpack.c.bf16 %v980_v2, %v979_v7  ;;  %v982_v37 = vld [vmem:[%s4980_s3 + $0x428] sm:$0xff]  ;;  %v992_v19 = vld [vmem:[%s4980_s3 + $0x478] sm:$0xff] }
  0xc8   : > { %1430 = vmatmul.mubr.f32.gmra.mrb[56].mxu0 %v4271_v35  ;;  %1209 = vmatprep.mubr.f32.mxu1 %v4278_v47  ;;  %v4312_v46 = vmax.f32 %v394_v4, 0.0  ;;  %v5141_v4 = vld [vmem:[#allocation42_spill] sm:$0xff]  ;;  %v5142_v5 = vld [vmem:[#allocation20_spill] sm:$0xff] }
  0xc9   : > { %1434 = vmatprep.mubr.f32.mxu0 %v4253_v29  ;;  %v5143_v7 = vld [vmem:[#allocation14_spill] sm:$0xff] }
  0xca   : > { %v5145_v2 = vld [vmem:[#allocation18_spill] sm:$0xff] }
  0xcb   : > { %1210 = vmatmul.mubr.f32.gmra.mrb[58].mxu1 %v4220_v41 }
  0xcc   : > { %1435 = vmatmul.mubr.f32.gmra.mrb[58].mxu0 %v4294_v22  ;;  %1214 = vmatprep.mubr.f32.mxu1 %v4297_v62 }
  0xcd   : > { %2272 = vmatprep.mubr.msk.f32.mxu0 %vm457_vm0, %v4289_v53 }
  0xcf   : > { %2256 = vmatmul.mubr.msk.f32.gmra.mrb[60].mxu1 %vm457_vm0, %v4248_v28 }
  0xd0   : > { %1440 = vmatmul.mubr.f32.gmra.mrb[60].mxu0 %v4307_v43  ;;  %1219 = vmatprep.mubr.f32.mxu1 %v4310_v12 }
  0xd1   : > { %1444 = vmatprep.mubr.f32.mxu0 %v4312_v46 }
  0xd3   : > { %1220 = vmatmul.mubr.f32.gmra.mrb[62].mxu1 %v4253_v29 }
  0xd4   : > { %1445 = vmatmul.mubr.f32.gmra.mrb[62].mxu0 %v4321_v34  ;;  %1779 = vmatprep.mubr.f32.mxu1 %v3805_v27 }
  0xd5   : > { %1514 = vmatprep.mubr.f32.mxu0 %v3407_v50  ;;  %v983_v50 = vld [vmem:[%s4980_s3 + $0x430] sm:$0xff] }
  0xd7   : > { %2277 = vmatmul.mubr.msk.f32.vlgmr.msra.gmra.mrb[64].mxu1 %vm457_vm0, %v3664_v63  ;;  %v987_v63 = vld [vmem:[%s4980_s3 + $0x450] sm:$0xff] }
  0xd8   : > { %1515 = vmatmul.mubr.f32.vlgmr.msra.gmra.mrb[0].mxu0 %v3367_v30  ;;  %2617 = vmatpush3.bf16.msra.mxu1 %v3996_v60  ;;  %v2622_v30 = vpack.c.bf16 %v982_v37, %v981_v8  ;;  %v991_v60 = vld [vmem:[%s4980_s3 + $0x470] sm:$0xff]  ;;  %v5148_v8 = vld [vmem:[#allocation17_spill] sm:$0xff]  ;;  %v5149_v37 = vld [vmem:[#allocation38_spill] sm:$0xff] }
  0xd9   : > { %2568 = vmatpush1.bf16.msra.mxu0 %v3331_v10  ;;  %1519 = vmatprep.mubr.f32.mxu0 %v3448_v56  ;;  %v984_v10 = vld [vmem:[%s4980_s3 + $0x438] sm:$0xff]  ;;  %v985_v56 = vld [vmem:[%s4980_s3 + $0x440] sm:$0xff] }
  0xda   : > { %1784 = vmatprep.mubr.f32.mxu1 %v3842_v1  ;;  %2569 = vmatprep.subr.bf16.mxu0 %v5098_v38 }
  0xdb   : > { %1785 = vmatmul.mubr.f32.gmra.mrb[66].mxu1 %v3720_v20  ;;  %2619 = vmatprep.subr.bf16.mxu1 %v2618_v33  ;;  %v988_v20 = vld [vmem:[%s4980_s3 + $0x458] sm:$0xff] }
  0xdc   : > { %1520 = vmatmul.mubr.f32.gmra.mrb[2].mxu0 %v3410_v51  ;;  %1789 = vmatprep.mubr.f32.mxu1 %v3881_v40  ;;  %v2626_v51 = vpack.c.bf16 %v984_v10, %v983_v50  ;;  %v5151_v50 = vld [vmem:[#allocation47_spill] sm:$0xff]  ;;  %v5152_v10 = vld [vmem:[#allocation26_spill] sm:$0xff] }
  0xdd   : > { %1524 = vmatprep.mubr.f32.mxu0 %v3495_v31  ;;  %2571 = vmatpush1.bf16.msra.mxu0 %v3381_v36  ;;  %v986_v36 = vld [vmem:[%s4980_s3 + $0x448] sm:$0xff] }
  0xde   : > { %2621 = vmatpush3.bf16.msra.mxu1 %v2618_v33  ;;  %2572 = vmatprep.subr.bf16.mxu0 %v5098_v38  ;;  %v5146_v33 = vld [vmem:[#allocation45_spill] sm:$0xff] }
  0xdf   : > { %2278 = vmatmul.mubr.msk.f32.gmra.mrb[68].mxu1 %vm457_vm0, %v3759_v11  ;;  %2623 = vmatprep.subr.bf16.mxu1 %v2622_v30  ;;  %v2630_v11 = vpack.c.bf16 %v986_v36, %v985_v56  ;;  %v5154_v56 = vld [vmem:[#allocation40_spill] sm:$0xff] }
  0xe0   : > { %1525 = vmatmul.mubr.f32.gmra.mrb[4].mxu0 %v3456_v13  ;;  %1794 = vmatprep.mubr.f32.mxu1 %v3926_v61  ;;  %v5155_v36 = vld [vmem:[#allocation24_spill] sm:$0xff] }
  0xe1   : > { %1529 = vmatprep.mubr.f32.mxu0 %v3535_v54  ;;  %2574 = vmatpush1.bf16.msra.mxu0 %v3417_v57  ;;  %v2634_v57 = vpack.c.bf16 %v988_v20, %v987_v63  ;;  %v5157_v63 = vld [vmem:[#allocation28_spill] sm:$0xff]  ;;  %v5158_v20 = vld [vmem:[#allocation22_spill] sm:$0xff] }
  0xe2   : > { %2575 = vmatprep.subr.bf16.mxu0 %v5098_v38  ;;  %2625 = vmatpush3.bf16.msra.mxu1 %v2622_v30  ;;  %v5150_v30 = vld [vmem:[#allocation21_spill] sm:$0xff] }
  0xe3   : > { %1795 = vmatmul.mubr.f32.gmra.mrb[70].mxu1 %v3792_v14  ;;  %2627 = vmatprep.subr.bf16.mxu1 %v2626_v51  ;;  %v989_v14 = vld [vmem:[%s4980_s3 + $0x460] sm:$0xff] }
  0xe4   : > { %1530 = vmatmul.mubr.f32.gmra.mrb[6].mxu0 %v3498_v32  ;;  %1799 = vmatprep.mubr.f32.mxu1 %v3967_v44 }
  0xe5   : > { %1534 = vmatprep.mubr.f32.mxu0 %v3565_v16  ;;  %2577 = vmatpush1.bf16.msra.mxu0 %v3466_v17  ;;  %v990_v17 = vld [vmem:[%s4980_s3 + $0x468] sm:$0xff] }
  0xe6   : > { %2578 = vmatprep.subr.bf16.mxu0 %v5098_v38  ;;  %2629 = vmatpush3.bf16.msra.mxu1 %v2626_v51  ;;  %v5153_v51 = vld [vmem:[#allocation19_spill] sm:$0xff] }
  0xe7   : > { %2279 = vmatmul.mubr.msk.f32.gmra.mrb[72].mxu1 %vm457_vm0, %v3864_v9  ;;  %2631 = vmatprep.subr.bf16.mxu1 %v2630_v11  ;;  %v2638_v9 = vpack.c.bf16 %v990_v17, %v989_v14  ;;  %v5160_v14 = vld [vmem:[#allocation30_spill] sm:$0xff]  ;;  %v5161_v17 = vld [vmem:[#allocation25_spill] sm:$0xff] }
  0xe8   : > { %1535 = vmatmul.mubr.f32.gmra.mrb[8].mxu0 %v3538_v58  ;;  %1804 = vmatprep.mubr.f32.mxu1 %v4014_v23 }
  0xe9   : > { %1539 = vmatprep.mubr.f32.mxu0 %v3621_v52  ;;  %2580 = vmatpush1.bf16.msra.mxu0 %v3508_v39  ;;  %v2642_v39 = vpack.c.bf16 %v992_v19, %v991_v60  ;;  %v5163_v60 = vld [vmem:[#allocation53_spill] sm:$0xff]  ;;  %v5164_v19 = vld [vmem:[#allocation32_spill] sm:$0xff] }
  0xea   : > { %2581 = vmatprep.subr.bf16.mxu0 %v5098_v38  ;;  %2633 = vmatpush3.bf16.msra.mxu1 %v2630_v11  ;;  %v5156_v11 = vld [vmem:[#allocation49_spill] sm:$0xff] }
  0xeb   : > { %1805 = vmatmul.mubr.f32.gmra.mrb[74].mxu1 %v3884_v0  ;;  %2635 = vmatprep.subr.bf16.mxu1 %v2634_v57  ;;  %v5140_v0 = vld [vmem:[#allocation15_spill] sm:$0xff] }
  0xec   : > { %1540 = vmatmul.mubr.f32.gmra.mrb[10].mxu0 %v3584_v24  ;;  %1809 = vmatprep.mubr.f32.mxu1 %v4042_v49 }
  0xed   : > { %1544 = vmatprep.mubr.f32.mxu0 %v3660_v21  ;;  %2583 = vmatpush1.bf16.msra.mxu0 %v3554_v6  ;;  %v5144_v6 = vld [vmem:[#allocation35_spill] sm:$0xff] }
  0xee   : > { %2584 = vmatprep.subr.bf16.mxu0 %v5098_v38  ;;  %2637 = vmatpush3.bf16.msra.mxu1 %v2634_v57  ;;  %v5159_v57 = vld [vmem:[#allocation52_spill] sm:$0xff] }
  0xef   : > { %2280 = vmatmul.mubr.msk.f32.gmra.mrb[76].mxu1 %vm457_vm0, %v3930_v3  ;;  %2639 = vmatprep.subr.bf16.mxu1 %v2638_v9  ;;  %v5147_v3 = vld [vmem:[#allocation23_spill] sm:$0xff] }
  0xf0   : > { %1545 = vmatmul.mubr.f32.gmra.mrb[12].mxu0 %v5140_v0  ;;  %1814 = vmatprep.mubr.f32.mxu1 %v5141_v4 }
  0xf1   : > { %1549 = vmatprep.mubr.f32.mxu0 %v5142_v5  ;;  %2586 = vmatpush1.bf16.msra.mxu0 %v5143_v7  ;;  %v5168_v7 = vld [vmem:[#allocation34_spill] sm:$0xff] }
  0xf2   : > { %2587 = vmatprep.subr.bf16.mxu0 %v5098_v38  ;;  %2641 = vmatpush3.bf16.msra.mxu1 %v2638_v9  ;;  %v5162_v9 = vld [vmem:[#allocation43_spill] sm:$0xff] }
  0xf3   : > { %1815 = vmatmul.mubr.f32.gmra.mrb[78].mxu1 %v5144_v6  ;;  %2643 = vmatprep.subr.bf16.mxu1 %v2642_v39  ;;  %v5170_v6 = vld [vmem:[#allocation37_spill] sm:$0xff] }
  0xf4   : > { %1550 = vmatmul.mubr.f32.gmra.mrb[14].mxu0 %v5145_v2  ;;  %1819 = vmatprep.mubr.f32.mxu1 %v5146_v33 }
  0xf5   : > { %1554 = vmatprep.mubr.f32.mxu0 %v5147_v3  ;;  %2589 = vmatpush1.bf16.msra.mxu0 %v5148_v8  ;;  %v5171_v8 = vld [vmem:[#allocation31_spill] sm:$0xff] }
  0xf6   : > { %2590 = vmatprep.subr.bf16.mxu0 %v5098_v38  ;;  %2645 = vmatpush3.bf16.msra.mxu1 %v2642_v39  ;;  %v5165_v39 = vld [vmem:[#allocation27_spill] sm:$0xff] }
  0xf7   : > { %2281 = vmatmul.mubr.msk.f32.gmra.mrb[80].mxu1 %vm457_vm0, %v5149_v37  ;;  %v273_v37 = vld [vmem:[%s3130_s9 + $0x190] sm:$0x3] }
  0xf8   : > { %1555 = vmatmul.mubr.f32.gmra.mrb[16].mxu0 %v5150_v30  ;;  %1824 = vmatprep.mubr.f32.mxu1 %v5151_v50 }
  0xf9   : > { %1559 = vmatprep.mubr.f32.mxu0 %v5152_v10  ;;  %2592 = vmatpush1.bf16.msra.mxu0 %v5153_v51  ;;  %v5173_v51 = vld [vmem:[#allocation60_spill] sm:$0xff] }
  0xfa   : > { %2593 = vmatprep.subr.bf16.mxu0 %v5098_v38 }
  0xfb   : > { %1825 = vmatmul.mubr.f32.gmra.mrb[82].mxu1 %v5154_v56  ;;  %v334_v56 = vmul.f32 %v3975_v45, %v273_v37  ;;  %v4493_v45 = vsel %vm457_vm0, %v4289_v53, 0.0 }
  0xfc   : > { %1560 = vmatmul.mubr.f32.gmra.mrb[18].mxu0 %v5155_v36  ;;  %1829 = vmatprep.mubr.f32.mxu1 %v5156_v11 }
  0xfd   : > { %1564 = vmatprep.mubr.f32.mxu0 %v5157_v63  ;;  %2595 = vmatpush1.bf16.msra.mxu0 %v5158_v20  ;;  %v5176_v20 = vld [vmem:[#allocation62_spill] sm:$0xff] }
  0xfe   : > { %2596 = vmatprep.subr.bf16.mxu0 %v5098_v38 }
  0xff   : > { %2282 = vmatmul.mubr.msk.f32.gmra.mrb[84].mxu1 %vm457_vm0, %v4073_v42  ;;  %v5167_v42 = vld [vmem:[#allocation57_spill] sm:$0xff] }
 0x100   : > { %1565 = vmatmul.mubr.f32.gmra.mrb[20].mxu0 %v3805_v27  ;;  %1834 = vmatprep.mubr.f32.mxu1 %v5159_v57  ;;  %v5166_v27 = vld [vmem:[#allocation48_spill] sm:$0xff] }
 0x101   : > { %1569 = vmatprep.mubr.f32.mxu0 %v5160_v14  ;;  %2598 = vmatpush1.bf16.msra.mxu0 %v5161_v17  ;;  %v5177_v17 = vld [vmem:[#allocation41_spill] sm:$0xff] }
 0x102   : > { %2599 = vmatprep.subr.bf16.mxu0 %v5098_v38 }
 0x103   : > { %1835 = vmatmul.mubr.f32.gmra.mrb[86].mxu1 %v5162_v9  ;;  %v5178_v9 = vld [vmem:[#allocation36_spill] sm:$0xff] }
 0x104   : > { %1570 = vmatmul.mubr.f32.gmra.mrb[22].mxu0 %v3842_v1  ;;  %1839 = vmatprep.mubr.f32.mxu1 %v5163_v60  ;;  %v5169_v1 = vld [vmem:[#allocation29_spill] sm:$0xff] }
 0x105   : > { %1574 = vmatprep.mubr.f32.mxu0 %v5164_v19  ;;  %2601 = vmatpush1.bf16.msra.mxu0 %v5165_v39 }
 0x106   : > { %2602 = vmatprep.subr.bf16.mxu0 %v5098_v38 }
 0x107   : > { %2283 = vmatmul.mubr.msk.f32.gmra.mrb[88].mxu1 %vm457_vm0, %v5166_v27  ;;  %v5184_v27 = vld [vmem:[#allocation5_spill] sm:$0xff] }
 0x108   : > { %1575 = vmatmul.mubr.f32.gmra.mrb[24].mxu0 %v3881_v40  ;;  %1844 = vmatprep.mubr.f32.mxu1 %v5167_v42  ;;  %v5172_v40 = vld [vmem:[#allocation54_spill] sm:$0xff] }
 0x109   : > { %1579 = vmatprep.mubr.f32.mxu0 %v5168_v7  ;;  %2604 = vmatpush1.bf16.msra.mxu0 %v5169_v1  ;;  %v5185_v1 = vld [vmem:[#allocation56_spill] sm:$0xff] }
 0x10a   : > { %2605 = vmatprep.subr.bf16.mxu0 %v5098_v38 }
 0x10b   : > { %1845 = vmatmul.mubr.f32.gmra.mrb[90].mxu1 %v4126_v15  ;;  %v5174_v15 = vld [vmem:[#allocation39_spill] sm:$0xff] }
 0x10c   : > { %1580 = vmatmul.mubr.f32.gmra.mrb[26].mxu0 %v3926_v61  ;;  %1849 = vmatprep.mubr.f32.mxu1 %v4218_v18  ;;  %v5175_v61 = vld [vmem:[#allocation33_spill] sm:$0xff] }
 0x10d   : > { %1584 = vmatprep.mubr.f32.mxu0 %v5170_v6  ;;  %2607 = vmatpush1.bf16.msra.mxu0 %v5171_v8 }
 0x10e   : > { %2608 = vmatprep.subr.bf16.mxu0 %v5098_v38 }
 0x10f   : > { %2284 = vmatmul.mubr.msk.f32.gmra.mrb[92].mxu1 %vm457_vm0, %v5172_v40  ;;  %v5187_v40 = vld [vmem:[#allocation58_spill] sm:$0xff] }
 0x110   : > { %1585 = vmatmul.mubr.f32.gmra.mrb[28].mxu0 %v3967_v44  ;;  %1854 = vmatprep.mubr.f32.mxu1 %v5173_v51  ;;  %v395_v44 = vadd.f32 %v4006_v59, %v334_v56  ;;  %v5180_v59 = vld [vmem:[#allocation46_spill] sm:$0xff] }
 0x111   : > { %1589 = vmatprep.mubr.f32.mxu0 %v5174_v15  ;;  %2610 = vmatpush1.bf16.msra.mxu0 %v5175_v61  ;;  %v5188_v61 = vld [vmem:[#allocation59_spill] sm:$0xff] }
 0x112   : > { %2611 = vmatprep.subr.bf16.mxu0 %v5098_v38  ;;  %v5179_v38 = vld [vmem:[#allocation44_spill] sm:$0xff] }
 0x113   : > { %1855 = vmatmul.mubr.f32.gmra.mrb[94].mxu1 %v4175_v26  ;;  %v819_v26 = vrot.slane %v4312_v46, 1 }
 0x114   : > { %1590 = vmatmul.mubr.f32.gmra.mrb[30].mxu0 %v4014_v23  ;;  %1859 = vmatprep.mubr.f32.mxu1 %v5176_v20  ;;  %v449_v23 = vmax.f32 %v395_v44, 0.0 }
 0x115   : > { %1594 = vmatprep.mubr.f32.mxu0 %v5177_v17  ;;  %2613 = vmatpush1.bf16.msra.mxu0 %v5178_v9  ;;  %v5189_v9 = vld [vmem:[#allocation61_spill] sm:$0xff] }
 0x117   : > { %2285 = vmatmul.mubr.msk.f32.gmra.mrb[96].mxu1 %vm457_vm0, %v4209_v25  ;;  %v4503_v25 = vsel %vm468_vm1, %v449_v23, 0.0  ;;  %v5192_v23 = vld [vmem:[#allocation9_spill] sm:$0xff] }
 0x118   : > { %1595 = vmatmul.mubr.f32.gmra.mrb[32].mxu0 %v4042_v49  ;;  %1864 = vmatprep.mubr.f32.mxu1 %v4278_v47  ;;  %v818_v49 = vrot.slane %v4493_v45, 1  ;;  %v821_v39 = vrot.slane %v4503_v25, 1 }
 0x119   : > { %1599 = vmatprep.mubr.f32.mxu0 %v5179_v38 }
 0x11b   : > { %1865 = vmatmul.mubr.f32.gmra.mrb[98].mxu1 %v4220_v41  ;;  %v5181_v41 = vld [vmem:[#allocation50_spill] sm:$0xff] }
 0x11c   : > { %1600 = vmatmul.mubr.f32.gmra.mrb[34].mxu0 %v5141_v4  ;;  %1869 = vmatprep.mubr.f32.mxu1 %v4297_v62  ;;  %v4512_v4 = vsel %vm589_vm2, %v818_v49, %v819_v26  ;;  %v5193_v49 = vld [vmem:[#allocation10_spill] sm:$0xff] }
 0x11d   : > { %1604 = vmatprep.mubr.f32.mxu0 %v5180_v59 }
 0x11f   : > { %2286 = vmatmul.mubr.msk.f32.gmra.mrb[100].mxu1 %vm457_vm0, %v4248_v28  ;;  %v4520_v28 = vsel %vm589_vm2, %v819_v26, %v821_v39  ;;  %v5198_v39 = vld [vmem:[#allocation16_spill] sm:$0xff] }
 0x120   : > { %1605 = vmatmul.mubr.f32.gmra.mrb[36].mxu0 %v5146_v33  ;;  %1874 = vmatprep.mubr.f32.mxu1 %v4310_v12  ;;  %v5183_v33 = vld [vmem:[#allocation55_spill] sm:$0xff] }
 0x121   : > { %1609 = vmatprep.mubr.f32.mxu0 %v5181_v41 }
 0x123   : > { %1875 = vmatmul.mubr.f32.gmra.mrb[102].mxu1 %v4253_v29 }
 0x124   : > { %1610 = vmatmul.mubr.f32.gmra.mrb[38].mxu0 %v5151_v50  ;;  %1879 = vmatprep.mubr.f32.mxu1 %v4512_v4 }
 0x125   : > { %1614 = vmatprep.mubr.f32.mxu0 %v5182_v55 }
 0x127   : > { %2287 = vmatmul.mubr.msk.f32.gmra.mrb[104].mxu1 %vm457_vm0, %v4289_v53  ;;  %v5186_v53 = vmov 0.0  }
 0x128   : > { %1615 = vmatmul.mubr.f32.gmra.mrb[40].mxu0 %v5156_v11  ;;  %1884 = vmatprep.mubr.f32.mxu1 %v4520_v28 }
 0x129   : > { %1619 = vmatprep.mubr.f32.mxu0 %v5183_v33 }
 0x12a   : > { %v4528_v29 = vpop.f32.mrb[0].mxu1 }
 0x12b   : > { %1885 = vmatmul.mubr.f32.gmra.mrb[106].mxu1 %v4312_v46  ;;  %v1068_v50 = vpop.f32.mrb[1].mxu1 }
 0x12c   : > { %1620 = vmatmul.mubr.f32.gmra.mrb[42].mxu0 %v5159_v57  ;;  %1889 = vmatprep.mubr.f32.mxu1 %v5184_v27 }
 0x12d   : > { %1624 = vmatprep.mubr.f32.mxu0 %v5185_v1 }
 0x12e   : > { %v4534_v8 = vpop.f32.mrb[2].mxu1 }
 0x12f   : > { %1890 = vmatmul.mubr.f32.gmra.mrb[108].mxu1 %v5186_v53  ;;  %v1073_v11 = vpop.f32.mrb[3].mxu1 }
 0x130   : > { %1625 = vmatmul.mubr.f32.gmra.mrb[44].mxu0 %v5163_v60  ;;  %1894 = vmatprep.mubr.f32.mxu1 %v5184_v27 }
 0x131   : > { %1629 = vmatprep.mubr.f32.mxu0 %v5187_v40 }
 0x132   : > { %v4540_v37 = vpop.f32.mrb[4].mxu1 }
 0x133   : > { %1895 = vmatmul.mubr.f32.gmra.mrb[110].mxu1 %v5186_v53  ;;  %v1078_v57 = vpop.f32.mrb[5].mxu1 }
 0x134   : > { %1630 = vmatmul.mubr.f32.gmra.mrb[46].mxu0 %v5167_v42  ;;  %2374 = vmatprep.mubr.f32.mxu1 %v3495_v31 }
 0x135   : > { %1634 = vmatprep.mubr.f32.mxu0 %v5188_v61 }
 0x136   : > { %v4546_v56 = vpop.f32.mrb[6].mxu1 }
 0x137   : > { %2375 = vmatmul.mubr.f32.vlgmr.msra.gmra.mrb[112].mxu1 %v3535_v54  ;;  %v1083_v60 = vpop.f32.mrb[7].mxu1 }
 0x138   : > { %1635 = vmatmul.mubr.f32.gmra.mrb[48].mxu0 %v4218_v18  ;;  %2377 = vmatprep.mubr.f32.mxu1 %v3565_v16  ;;  %v825_v18 = vrot.slane %v4493_v45, 2 }
 0x139   : > { %1639 = vmatprep.mubr.f32.mxu0 %v5189_v9 }
 0x13a   : > { %v4552_v44 = vpop.f32.mrb[8].mxu1 }
 0x13b   : > { %2378 = vmatmul.mubr.f32.gmra.mrb[114].mxu1 %v3621_v52  ;;  %v1088_v42 = vpop.f32.mrb[9].mxu1 }
 0x13c   : > { %1640 = vmatmul.mubr.f32.gmra.mrb[50].mxu0 %v5173_v51  ;;  %2380 = vmatprep.mubr.f32.mxu1 %v3660_v21 }
 0x13d   : > { %1644 = vmatprep.mubr.f32.mxu0 %v4271_v35 }
 0x13e   : > { %v4558_v31 = vpop.f32.mrb[10].mxu1 }
 0x13f   : > { %2381 = vmatmul.mubr.f32.gmra.mrb[116].mxu1 %v5142_v5  ;;  %v1093_v54 = vpop.f32.mrb[11].mxu1  ;;  %v826_v5 = vrot.slane %v4312_v46, 2 }
 0x140   : > { %1645 = vmatmul.mubr.f32.gmra.mrb[52].mxu0 %v5176_v20  ;;  %2383 = vmatprep.mubr.f32.mxu1 %v5147_v3 }
 0x141   : > { %1649 = vmatprep.mubr.f32.mxu0 %v4294_v22 }
 0x142   : > { %v4564_v16 = vpop.f32.mrb[12].mxu1 }
 0x143   : > { %2384 = vmatmul.mubr.f32.gmra.mrb[118].mxu1 %v5152_v10  ;;  %v1098_v52 = vpop.f32.mrb[13].mxu1  ;;  %v827_v10 = vsel %vm702_vm3, %v825_v18, %v826_v5 }
 0x144   : > { %1650 = vmatmul.mubr.f32.gmra.mrb[54].mxu0 %v4278_v47  ;;  %2386 = vmatprep.mubr.f32.mxu1 %v5157_v63  ;;  %v828_v63 = vrot.slane %v4503_v25, 2  ;;  %v5194_v25 = vld [vmem:[#allocation11_spill] sm:$0xff] }
 0x145   : > { %1654 = vmatprep.mubr.f32.mxu0 %v4307_v43 }
 0x146   : > { %v4570_v21 = vpop.f32.mrb[14].mxu1 }
 0x147   : > { %2387 = vmatmul.mubr.f32.gmra.mrb[120].mxu1 %v5160_v14  ;;  %v1103_v3 = vpop.f32.mrb[15].mxu1 }
 0x148   : > { %1655 = vmatmul.mubr.f32.gmra.mrb[56].mxu0 %v4297_v62  ;;  %2389 = vmatprep.mubr.f32.mxu1 %v5164_v19  ;;  %v829_v62 = vsel %vm702_vm3, %v826_v5, %v828_v63 }
 0x149   : > { %1659 = vmatprep.mubr.f32.mxu0 %v4321_v34 }
 0x14a   : > { %v4578_v47 = vpop.f32.mrb[16].mxu1 }
 0x14b   : > { %2390 = vmatmul.mubr.f32.gmra.mrb[122].mxu1 %v5168_v7  ;;  %v1108_v51 = vpop.f32.mrb[17].mxu1 }
 0x14c   : > { %1660 = vmatmul.mubr.f32.gmra.mrb[58].mxu0 %v4310_v12  ;;  %2392 = vmatprep.mubr.f32.mxu1 %v5170_v6 }
 0x14d   : > { %1664 = vmatprep.mubr.f32.mxu0 %v827_v10 }
 0x14e   : > { %v4585_v46 = vpop.f32.mrb[18].mxu1 }
 0x14f   : > { %2393 = vmatmul.mubr.f32.gmra.mrb[124].mxu1 %v5174_v15  ;;  %v1113_v14 = vpop.f32.mrb[19].mxu1  ;;  %v5190_v15 = vld [vmem:[#allocation7_spill] sm:$0xff] }
 0x150   : > { %1665 = vmatmul.mubr.f32.gmra.mrb[60].mxu0 %v4512_v4  ;;  %2395 = vmatprep.mubr.f32.mxu1 %v5177_v17  ;;  %v5196_v4 = vld [vmem:[#allocation13_spill] sm:$0xff] }
 0x151   : > { %1669 = vmatprep.mubr.f32.mxu0 %v829_v62 }
 0x152   : > { %v4591_v19 = vpop.f32.mrb[20].mxu1 }
 0x153   : > { %2396 = vmatmul.mubr.f32.gmra.mrb[126].mxu1 %v5179_v38  ;;  %v1118_v12 = vpop.f32.mrb[21].mxu1  ;;  %v5191_v38 = vld [vmem:[#allocation8_spill] sm:$0xff] }
 0x154   : > { %1670 = vmatmul.mubr.f32.gmra.mrb[62].mxu0 %v4520_v28  ;;  %2398 = vmatprep.mubr.f32.mxu1 %v5180_v59 }
 0x155   : > { %1739 = vmatprep.mubr.f32.mxu0 %v3456_v13 }
 0x156   : > { %v4597_v7 = vpop.f32.mrb[22].mxu1 }
 0x157   : > { %2399 = vmatmul.mubr.f32.gmra.mrb[128].mxu1 %v5181_v41  ;;  %v1123_v6 = vpop.f32.mrb[23].mxu1  ;;  %v5195_v41 = vld [vmem:[#allocation12_spill] sm:$0xff] }
 0x158   : > { %2273 = vmatmul.mubr.msk.f32.vlgmr.msra.gmra.mrb[0].mxu0 %vm457_vm0, %v5190_v15  ;;  %2401 = vmatprep.mubr.f32.mxu1 %v5182_v55 }
 0x159   : > { %1744 = vmatprep.mubr.f32.mxu0 %v3498_v32 }
 0x15a   : > { %v4605_v20 = vpop.f32.mrb[24].mxu1 }
 0x15b   : > { %2402 = vmatmul.mubr.f32.gmra.mrb[130].mxu1 %v5183_v33  ;;  %v1128_v17 = vpop.f32.mrb[25].mxu1 }
 0x15c   : > { %1745 = vmatmul.mubr.f32.gmra.mrb[2].mxu0 %v5191_v38  ;;  %2404 = vmatprep.mubr.f32.mxu1 %v5185_v1 }
 0x15d   : > { %1749 = vmatprep.mubr.f32.mxu0 %v3538_v58 }
 0x15e   : > { %v4611_v13 = vpop.f32.mrb[26].mxu1 }
 0x15f   : > { %2405 = vmatmul.mubr.f32.gmra.mrb[132].mxu1 %v5187_v40  ;;  %v1133_v45 = vpop.f32.mrb[27].mxu1 }
 0x160   : > { %2274 = vmatmul.mubr.msk.f32.gmra.mrb[4].mxu0 %vm457_vm0, %v5192_v23  ;;  %2407 = vmatprep.mubr.f32.mxu1 %v5188_v61 }
 0x161   : > { %1754 = vmatprep.mubr.f32.mxu0 %v3584_v24 }
 0x162   : > { %v4619_v32 = vpop.f32.mrb[28].mxu1 }
 0x163   : > { %2408 = vmatmul.mubr.f32.gmra.mrb[134].mxu1 %v5189_v9  ;;  %v1138_v59 = vpop.f32.mrb[29].mxu1 }
 0x164   : > { %1755 = vmatmul.mubr.f32.gmra.mrb[6].mxu0 %v5193_v49  ;;  %2410 = vmatprep.mubr.f32.mxu1 %v4271_v35 }
 0x165   : > { %1759 = vmatprep.mubr.f32.mxu0 %v5140_v0 }
 0x166   : > { %v4625_v58 = vpop.f32.mrb[30].mxu1 }
 0x167   : > { %2411 = vmatmul.mubr.f32.gmra.mrb[136].mxu1 %v4294_v22  ;;  %v1143_v26 = vpop.f32.mrb[31].mxu1 }
 0x168   : > { %2275 = vmatmul.mubr.msk.f32.gmra.mrb[8].mxu0 %vm457_vm0, %v5194_v25  ;;  %2413 = vmatprep.mubr.f32.mxu1 %v4307_v43  ;;  %v5197_v43 = vld [vmem:[#allocation6_spill] sm:$0xff] }
 0x169   : > { %1764 = vmatprep.mubr.f32.mxu0 %v5145_v2 }
 0x16a   : > { %v4633_v24 = vpop.f32.mrb[32].mxu1 }
 0x16b   : > { %2414 = vmatmul.mubr.f32.gmra.mrb[138].mxu1 %v4321_v34  ;;  %v1148_v35 = vpop.f32.mrb[33].mxu1 }
 0x16c   : > { %1765 = vmatmul.mubr.f32.gmra.mrb[10].mxu0 %v5195_v41  ;;  %2416 = vmatprep.mubr.f32.mxu1 %v827_v10 }
 0x16d   : > { %1769 = vmatprep.mubr.f32.mxu0 %v5150_v30 }
 0x16e   : > { %v4638_v22 = vpop.f32.mrb[34].mxu1 }
 0x16f   : > { %2417 = vmatmul.mubr.f32.gmra.mrb[140].mxu1 %v829_v62  ;;  %v1153_v0 = vpop.f32.mrb[35].mxu1 }
 0x170   : > { %2276 = vmatmul.mubr.msk.f32.gmra.mrb[12].mxu0 %vm457_vm0, %v5196_v4  ;;  %2419 = vmatprep.mubr.f32.mxu1 %v5197_v43 }
 0x171   : > { %1774 = vmatprep.mubr.f32.mxu0 %v5155_v36 }
 0x172   : > { %v4645_v2 = vpop.f32.mrb[36].mxu1 }
 0x173   : > { %2420 = vmatmul.mubr.f32.gmra.mrb[142].mxu1 %v5197_v43  ;;  %v1158_v34 = vpop.f32.mrb[37].mxu1  ;;  %v4678_v43 = vld [vmem:[%s4981_s4] ss:$0 sm:$0xff] }
 0x174   : > { %1775 = vmatmul.mubr.f32.gmra.mrb[14].mxu0 %v5198_v39  ;;  %v1107_v34 = vadd.f32 %v4678_v43, %v4578_v47  ;;  %v1117_v47 = vadd.f32 %v4678_v43, %v4591_v19  ;;  %v1127_v19 = vadd.f32 %v4678_v43, %v4605_v20  ;;  %v1137_v20 = vadd.f32 %v4678_v43, %v4619_v32 }
 0x175   : > { %v1147_v32 = vadd.f32 %v4678_v43, %v4633_v24 }
 0x176   : > { %v4649_v30 = vpop.f32.mrb[38].mxu1 }
 0x177   : > { %v1163_v55 = vpop.f32.mrb[39].mxu1 }
 0x17a   : > { %v4651_v28 = vpop.f32.mrb[40].mxu1 }
 0x17b   : > { %v1168_v33 = vpop.f32.mrb[41].mxu1 }
 0x17e   : > { %v4653_v50 = vpop.f32.mrb[42].mxu1 }
 0x17f   : > { %v1173_v48 = vpop.f32.mrb[43].mxu1 }
 0x182   : > { %v4655_v27 = vpop.f32.mrb[44].mxu1 }
 0x183   : > { %v1178_v1 = vpop.f32.mrb[45].mxu1 }
 0x186   : > { %v4657_v36 = vpop.f32.mrb[46].mxu1 }
 0x187   : > { %v1183_v53 = vpop.f32.mrb[47].mxu1 }
 0x188   : > { %v1112_v53 = vadd.f32 %v4678_v43, %v4585_v46  ;;  %v1122_v46 = vadd.f32 %v4678_v43, %v4597_v7  ;;  %v1132_v7 = vadd.f32 %v4678_v43, %v4611_v13  ;;  %v1142_v13 = vadd.f32 %v4678_v43, %v4625_v58 }
 0x189   : > { %v1152_v58 = vadd.f32 %v4678_v43, %v4638_v22 }
 0x18a   : > { %v4659_v11 = vpop.f32.mrb[48].mxu1 }
 0x18b   : > { %v1188_v40 = vpop.f32.mrb[49].mxu1 }
 0x18e   : > { %v4661_v57 = vpop.f32.mrb[50].mxu1 }
 0x18f   : > { %v1193_v61 = vpop.f32.mrb[51].mxu1 }
 0x192   : > { %v4663_v60 = vpop.f32.mrb[52].mxu1 }
 0x193   : > { %v1198_v9 = vpop.f32.mrb[53].mxu1 }
 0x196   : > { %v4665_v42 = vpop.f32.mrb[54].mxu1 }
 0x197   : > { %v1203_v54 = vpop.f32.mrb[55].mxu1 }
 0x19a   : > { %v4667_v52 = vpop.f32.mrb[56].mxu1 }
 0x19b   : > { %v1208_v18 = vpop.f32.mrb[57].mxu1 }
 0x19e   : > { %v4669_v5 = vpop.f32.mrb[58].mxu1 }
 0x19f   : > { %v1213_v3 = vpop.f32.mrb[59].mxu1 }
 0x1a2   : > { %v4671_v10 = vpop.f32.mrb[60].mxu1 }
 0x1a3   : > { %v1218_v63 = vpop.f32.mrb[61].mxu1 }
 0x1a6   : > { %v4673_v51 = vpop.f32.mrb[62].mxu1 }
 0x1a7   : > { %v1223_v62 = vpop.f32.mrb[63].mxu1 }
 0x1aa   : > { %v1781_v14 = vpop.f32.mrb[64].mxu1 }
 0x1ab   : > { %v1783_v12 = vpop.f32.mrb[65].mxu1 }
 0x1ae   : > { %v1786_v6 = vpop.f32.mrb[66].mxu1 }
 0x1af   : > { %v1788_v15 = vpop.f32.mrb[67].mxu1 }
 0x1b2   : > { %v1791_v17 = vpop.f32.mrb[68].mxu1 }
 0x1b3   : > { %v1793_v38 = vpop.f32.mrb[69].mxu1 }
 0x1b6   : > { %v1796_v45 = vpop.f32.mrb[70].mxu1 }
 0x1b7   : > { %v1798_v23 = vpop.f32.mrb[71].mxu1 }
 0x1ba   : > { %v1801_v59 = vpop.f32.mrb[72].mxu1 }
 0x1bb   : > { %v1803_v49 = vpop.f32.mrb[73].mxu1 }
 0x1be   : > { %v1806_v26 = vpop.f32.mrb[74].mxu1 }
 0x1bf   : > { %v1808_v25 = vpop.f32.mrb[75].mxu1 }
 0x1c2   : > { %v1811_v35 = vpop.f32.mrb[76].mxu1 }
 0x1c3   : > { %v1813_v41 = vpop.f32.mrb[77].mxu1 }
 0x1c6   : > { %v1816_v0 = vpop.f32.mrb[78].mxu1 }
 0x1c7   : > { %v1818_v4 = vpop.f32.mrb[79].mxu1 }
 0x1ca   : > { %v4682_v39 = vpop.f32.mrb[80].mxu1 }
 0x1cb   : > { %v1556_v55 = vpop.f32.mrb[16].mxu0  ;;  %v1823_v33 = vpop.f32.mrb[81].mxu1 }
 0x1cc   : > { %v2695_v48 = vadd.f32 %v1556_v55, %v1107_v34  ;;  %v1558_v1 = vpop.f32.mrb[17].mxu0 }
 0x1ce   : > { %v4686_v40 = vpop.f32.mrb[82].mxu1  ;;  %v4688_v61 = vadd.f32 %v2695_v48, %v1781_v14 }
 0x1cf   : > { %v1561_v9 = vpop.f32.mrb[18].mxu0  ;;  %v1828_v54 = vpop.f32.mrb[83].mxu1 }
 0x1d0   : > { %v2698_v18 = vadd.f32 %v1561_v9, %v1112_v53  ;;  %v1563_v3 = vpop.f32.mrb[19].mxu0 }
 0x1d2   : > { %v4692_v63 = vpop.f32.mrb[84].mxu1  ;;  %v4694_v62 = vadd.f32 %v2698_v18, %v1786_v6 }
 0x1d3   : > { %v1566_v12 = vpop.f32.mrb[20].mxu0  ;;  %v1833_v15 = vpop.f32.mrb[85].mxu1 }
 0x1d4   : > { %v2701_v38 = vadd.f32 %v1566_v12, %v1117_v47  ;;  %v1568_v23 = vpop.f32.mrb[21].mxu0 }
 0x1d6   : > { %v4698_v14 = vpop.f32.mrb[86].mxu1  ;;  %v4700_v49 = vadd.f32 %v2701_v38, %v1791_v17 }
 0x1d7   : > { %v1571_v25 = vpop.f32.mrb[22].mxu0  ;;  %v1838_v41 = vpop.f32.mrb[87].mxu1 }
 0x1d8   : > { %v2704_v4 = vadd.f32 %v1571_v25, %v1122_v46  ;;  %v1573_v34 = vpop.f32.mrb[23].mxu0 }
 0x1da   : > { %v4704_v6 = vpop.f32.mrb[88].mxu1  ;;  %v4706_v55 = vadd.f32 %v2704_v4, %v1796_v45 }
 0x1db   : > { %v1576_v33 = vpop.f32.mrb[24].mxu0  ;;  %v1843_v48 = vpop.f32.mrb[89].mxu1 }
 0x1dc   : > { %v2707_v1 = vadd.f32 %v1576_v33, %v1127_v19  ;;  %v1578_v53 = vpop.f32.mrb[25].mxu0 }
 0x1de   : > { %v4710_v17 = vpop.f32.mrb[90].mxu1  ;;  %v4712_v9 = vadd.f32 %v2707_v1, %v1801_v59 }
 0x1df   : > { %v1581_v54 = vpop.f32.mrb[26].mxu0  ;;  %v1848_v18 = vpop.f32.mrb[91].mxu1 }
 0x1e0   : > { %v2710_v3 = vadd.f32 %v1581_v54, %v1132_v7  ;;  %v1583_v47 = vpop.f32.mrb[27].mxu0 }
 0x1e2   : > { %v4716_v45 = vpop.f32.mrb[92].mxu1  ;;  %v4718_v12 = vadd.f32 %v2710_v3, %v1806_v26 }
 0x1e3   : > { %v1586_v15 = vpop.f32.mrb[28].mxu0  ;;  %v1853_v38 = vpop.f32.mrb[93].mxu1 }
 0x1e4   : > { %v2713_v23 = vadd.f32 %v1586_v15, %v1137_v20  ;;  %v1588_v46 = vpop.f32.mrb[29].mxu0 }
 0x1e6   : > { %v4722_v59 = vpop.f32.mrb[94].mxu1  ;;  %v4724_v25 = vadd.f32 %v2713_v23, %v1811_v35 }
 0x1e7   : > { %v1591_v41 = vpop.f32.mrb[30].mxu0  ;;  %v1858_v4 = vpop.f32.mrb[95].mxu1 }
 0x1e8   : > { %v2716_v34 = vadd.f32 %v1591_v41, %v1142_v13  ;;  %v1593_v19 = vpop.f32.mrb[31].mxu0 }
 0x1ea   : > { %v4728_v26 = vpop.f32.mrb[96].mxu1  ;;  %v4730_v33 = vadd.f32 %v2716_v34, %v1816_v0  ;;  %v1157_v0 = vadd.f32 %v4678_v43, %v4645_v2 }
 0x1eb   : > { %v1596_v48 = vpop.f32.mrb[32].mxu0  ;;  %v1863_v1 = vpop.f32.mrb[97].mxu1 }
 0x1ec   : > { %v2719_v53 = vadd.f32 %v1596_v48, %v1147_v32  ;;  %v1598_v7 = vpop.f32.mrb[33].mxu0 }
 0x1ee   : > { %v4734_v35 = vpop.f32.mrb[98].mxu1  ;;  %v4737_v54 = vadd.f32 %v2719_v53, %v4682_v39  ;;  %v1162_v39 = vadd.f32 %v4678_v43, %v4649_v30 }
 0x1ef   : > { %v1601_v18 = vpop.f32.mrb[34].mxu0  ;;  %v1868_v3 = vpop.f32.mrb[99].mxu1 }
 0x1f0   : > { %v2722_v47 = vadd.f32 %v1601_v18, %v1152_v58  ;;  %v1603_v24 = vpop.f32.mrb[35].mxu0 }
 0x1f2   : > { %v4741_v20 = vpop.f32.mrb[100].mxu1  ;;  %v4744_v15 = vadd.f32 %v2722_v47, %v4686_v40  ;;  %v1167_v40 = vadd.f32 %v4678_v43, %v4651_v28 }
 0x1f3   : > { %v1606_v38 = vpop.f32.mrb[36].mxu0  ;;  %v1873_v23 = vpop.f32.mrb[101].mxu1 }
 0x1f4   : > { %v2725_v22 = vadd.f32 %v1606_v38, %v1157_v0  ;;  %v1608_v46 = vpop.f32.mrb[37].mxu0 }
 0x1f6   : > { %v4748_v13 = vpop.f32.mrb[102].mxu1  ;;  %v4751_v41 = vadd.f32 %v2725_v22, %v4692_v63  ;;  %v1172_v63 = vadd.f32 %v4678_v43, %v4653_v50 }
 0x1f7   : > { %v1611_v4 = vpop.f32.mrb[38].mxu0  ;;  %v1878_v34 = vpop.f32.mrb[103].mxu1 }
 0x1f8   : > { %v2728_v2 = vadd.f32 %v1611_v4, %v1162_v39  ;;  %v1613_v19 = vpop.f32.mrb[39].mxu0 }
 0x1fa   : > { %v4755_v32 = vpop.f32.mrb[104].mxu1  ;;  %v4758_v48 = vadd.f32 %v2728_v2, %v4698_v14  ;;  %v1177_v14 = vadd.f32 %v4678_v43, %v4655_v27 }
 0x1fb   : > { %v1616_v1 = vpop.f32.mrb[40].mxu0  ;;  %v1883_v53 = vpop.f32.mrb[105].mxu1 }
 0x1fc   : > { %v2731_v30 = vadd.f32 %v1616_v1, %v1167_v40  ;;  %v1618_v7 = vpop.f32.mrb[41].mxu0 }
 0x1fe   : > { %v4762_v58 = vpop.f32.mrb[106].mxu1  ;;  %v4765_v18 = vadd.f32 %v2731_v30, %v4704_v6  ;;  %v1182_v6 = vadd.f32 %v4678_v43, %v4657_v36 }
 0x1ff   : > { %v1621_v3 = vpop.f32.mrb[42].mxu0  ;;  %v1888_v47 = vpop.f32.mrb[107].mxu1 }
 0x200   : > { %v2734_v28 = vadd.f32 %v1621_v3, %v1172_v63  ;;  %v1623_v24 = vpop.f32.mrb[43].mxu0 }
 0x201   : > { %v1197_v24 = vadd.f32 %v4678_v43, %v4663_v60 }
 0x202   : > { %v4769_v0 = vpop.f32.mrb[108].mxu1  ;;  %v4772_v38 = vadd.f32 %v2734_v28, %v4710_v17  ;;  %v1187_v17 = vadd.f32 %v4678_v43, %v4659_v11 }
 0x203   : > { %v1626_v23 = vpop.f32.mrb[44].mxu0  ;;  %v1893_v22 = vpop.f32.mrb[109].mxu1 }
 0x204   : > { %v2737_v50 = vadd.f32 %v1626_v23, %v1177_v14  ;;  %v1628_v46 = vpop.f32.mrb[45].mxu0 }
 0x205   : > { %v1202_v46 = vadd.f32 %v4678_v43, %v4665_v42 }
 0x206   : > { %v4776_v39 = vpop.f32.mrb[110].mxu1  ;;  %v4779_v4 = vadd.f32 %v2737_v50, %v4716_v45  ;;  %v1192_v45 = vadd.f32 %v4678_v43, %v4661_v57 }
 0x207   : > { %v1631_v34 = vpop.f32.mrb[46].mxu0  ;;  %v1898_v2 = vpop.f32.mrb[111].mxu1 }
 0x208   : > { %v2740_v27 = vadd.f32 %v1631_v34, %v1182_v6  ;;  %v1633_v19 = vpop.f32.mrb[47].mxu0 }
 0x209   : > { %v1207_v19 = vadd.f32 %v4678_v43, %v4667_v52  ;;  %v1212_v52 = vadd.f32 %v4678_v43, %v4669_v5 }
 0x20a   : > { %v4783_v40 = vpop.f32.mrb[112].mxu1  ;;  %v4786_v1 = vadd.f32 %v2740_v27, %v4722_v59 }
 0x20b   : > { %v1636_v53 = vpop.f32.mrb[48].mxu0  ;;  %v4788_v30 = vpop.f32.mrb[113].mxu1 }
 0x20c   : > { %v2743_v36 = vadd.f32 %v1636_v53, %v1187_v17  ;;  %v1638_v7 = vpop.f32.mrb[49].mxu0 }
 0x20e   : > { %v4792_v63 = vpop.f32.mrb[114].mxu1  ;;  %v4795_v3 = vadd.f32 %v2743_v36, %v4728_v26 }
 0x20f   : > { %v1641_v11 = vpop.f32.mrb[50].mxu0  ;;  %v4797_v47 = vpop.f32.mrb[115].mxu1 }
 0x210   : > { %v2746_v59 = vadd.f32 %v1641_v11, %v1192_v45  ;;  %v1643_v28 = vpop.f32.mrb[51].mxu0 }
 0x212   : > { %v4801_v14 = vpop.f32.mrb[116].mxu1  ;;  %v4804_v23 = vadd.f32 %v2746_v59, %v4734_v35 }
 0x213   : > { %v1646_v57 = vpop.f32.mrb[52].mxu0  ;;  %v4806_v22 = vpop.f32.mrb[117].mxu1 }
 0x214   : > { %v2749_v50 = vadd.f32 %v1646_v57, %v1197_v24  ;;  %v1648_v26 = vpop.f32.mrb[53].mxu0 }
 0x215   : > { %v1217_v26 = vadd.f32 %v4678_v43, %v4671_v10 }
 0x216   : > { %v4811_v6 = vpop.f32.mrb[118].mxu1  ;;  %v4814_v34 = vadd.f32 %v2749_v50, %v4741_v20 }
 0x217   : > { %v1651_v60 = vpop.f32.mrb[54].mxu0  ;;  %v4816_v2 = vpop.f32.mrb[119].mxu1 }
 0x218   : > { %v2752_v35 = vadd.f32 %v1651_v60, %v1202_v46  ;;  %v1653_v27 = vpop.f32.mrb[55].mxu0 }
 0x21a   : > { %v2388_v17 = vpop.f32.mrb[120].mxu1  ;;  %v4823_v53 = vadd.f32 %v2752_v35, %v4748_v13 }
 0x21b   : > { %v1656_v42 = vpop.f32.mrb[56].mxu0  ;;  %v2012_v36 = vadd.f32 %v4694_v62, %v2388_v17  ;;  %v2006_v7 = vpop.f32.mrb[121].mxu1 }
 0x21c   : > { %v2755_v20 = vadd.f32 %v1656_v42, %v1207_v19  ;;  %v1658_v45 = vpop.f32.mrb[57].mxu0  ;;  %v2007_v11 = vadd.f32 %v4688_v61, %v2006_v7 }
 0x21d   : > { %2134 = vst [vmem:[%s4827_s30 + $0x48] sm:$0xff] %v2012_v36 }
 0x21e   : > { %2133 = vst [vmem:[%s4827_s30 + $0x40] sm:$0xff] %v2007_v11  ;;  %v2391_v13 = vpop.f32.mrb[122].mxu1  ;;  %v4834_v59 = vadd.f32 %v2755_v20, %v4755_v32 }
 0x21f   : > { %v1661_v62 = vpop.f32.mrb[58].mxu0  ;;  %v2022_v28 = vadd.f32 %v4706_v55, %v2391_v13  ;;  %v2016_v61 = vpop.f32.mrb[123].mxu1 }
 0x220   : > { %v2758_v24 = vadd.f32 %v1661_v62, %v1212_v52  ;;  %v1663_v57 = vpop.f32.mrb[59].mxu0  ;;  %v2017_v50 = vadd.f32 %v4700_v49, %v2016_v61  ;;  %v1222_v49 = vadd.f32 %v4678_v43, %v4673_v51 }
 0x221   : > { %2136 = vst [vmem:[%s4827_s30 + $0x58] sm:$0xff] %v2022_v28 }
 0x222   : > { %2135 = vst [vmem:[%s4827_s30 + $0x50] sm:$0xff] %v2017_v50  ;;  %v2394_v5 = vpop.f32.mrb[124].mxu1  ;;  %v4843_v46 = vadd.f32 %v2758_v24, %v4762_v58 }
 0x223   : > { %v1666_v32 = vpop.f32.mrb[60].mxu0  ;;  %v2032_v60 = vadd.f32 %v4718_v12, %v2394_v5  ;;  %v2026_v55 = vpop.f32.mrb[125].mxu1 }
 0x224   : > { %v2761_v35 = vadd.f32 %v1666_v32, %v1217_v26  ;;  %v1668_v27 = vpop.f32.mrb[61].mxu0  ;;  %v2027_v19 = vadd.f32 %v4712_v9, %v2026_v55  ;;  %v1067_v9 = vadd.f32 %v4678_v43, %v4528_v29  ;;  %v1072_v29 = vadd.f32 %v4678_v43, %v4534_v8 }
 0x225   : > { %2138 = vst [vmem:[%s4827_s30 + $0x68] sm:$0xff] %v2032_v60  ;;  %v1077_v8 = vadd.f32 %v4678_v43, %v4540_v37  ;;  %v1082_v37 = vadd.f32 %v4678_v43, %v4546_v56  ;;  %v1087_v56 = vadd.f32 %v4678_v43, %v4552_v44  ;;  %v1092_v44 = vadd.f32 %v4678_v43, %v4558_v31 }
 0x226   : > { %2137 = vst [vmem:[%s4827_s30 + $0x60] sm:$0xff] %v2027_v19  ;;  %v2397_v10 = vpop.f32.mrb[126].mxu1  ;;  %v4852_v17 = vadd.f32 %v2761_v35, %v4769_v0  ;;  %v1097_v31 = vadd.f32 %v4678_v43, %v4564_v16  ;;  %v1102_v16 = vadd.f32 %v4678_v43, %v4570_v21 }
 0x227   : > { %v1671_v58 = vpop.f32.mrb[62].mxu0  ;;  %v2042_v42 = vadd.f32 %v4730_v33, %v2397_v10  ;;  %v2036_v12 = vpop.f32.mrb[127].mxu1 }
 0x228   : > { %v2764_v36 = vadd.f32 %v1671_v58, %v1222_v49  ;;  %v1673_v7 = vpop.f32.mrb[63].mxu0  ;;  %v2037_v20 = vadd.f32 %v4724_v25, %v2036_v12 }
 0x229   : > { %2140 = vst [vmem:[%s4827_s30 + $0x78] sm:$0xff] %v2042_v42 }
 0x22a   : > { %2139 = vst [vmem:[%s4827_s30 + $0x70] sm:$0xff] %v2037_v20  ;;  %v2400_v51 = vpop.f32.mrb[128].mxu1  ;;  %v4861_v0 = vadd.f32 %v2764_v36, %v4776_v39 }
 0x22b   : > { %v1741_v45 = vpop.f32.mrb[0].mxu0  ;;  %v2052_v33 = vadd.f32 %v4744_v15, %v2400_v51  ;;  %v2046_v11 = vpop.f32.mrb[129].mxu1 }
 0x22c   : > { %v2679_v52 = vadd.f32 %v1741_v45, %v1067_v9  ;;  %v1743_v13 = vpop.f32.mrb[1].mxu0  ;;  %v2047_v62 = vadd.f32 %v4737_v54, %v2046_v11 }
 0x22d   : > { %2142 = vst [vmem:[%s4827_s30 + $0x88] sm:$0xff] %v2052_v33 }
 0x22e   : > { %v1967_v25 = vadd.f32 %v2679_v52, %v4788_v30  ;;  %2141 = vst [vmem:[%s4827_s30 + $0x80] sm:$0xff] %v2047_v62  ;;  %v2403_v28 = vpop.f32.mrb[130].mxu1 }
 0x22f   : > { %v1746_v39 = vpop.f32.mrb[2].mxu0  ;;  %v2062_v61 = vadd.f32 %v4758_v48, %v2403_v28  ;;  %v2056_v15 = vpop.f32.mrb[131].mxu1 }
 0x230   : > { %2125 = vst [vmem:[%s4827_s30] sm:$0xff] %v1967_v25  ;;  %v2681_v24 = vadd.f32 %v1746_v39, %v1072_v29  ;;  %v1748_v57 = vpop.f32.mrb[3].mxu0  ;;  %v2057_v54 = vadd.f32 %v4751_v41, %v2056_v15 }
 0x231   : > { %2144 = vst [vmem:[%s4827_s30 + $0x98] sm:$0xff] %v2062_v61 }
 0x232   : > { %v1972_v30 = vadd.f32 %v2681_v24, %v4783_v40  ;;  %2143 = vst [vmem:[%s4827_s30 + $0x90] sm:$0xff] %v2057_v54  ;;  %v2406_v50 = vpop.f32.mrb[132].mxu1 }
 0x233   : > { %v1751_v26 = vpop.f32.mrb[4].mxu0  ;;  %v2072_v48 = vadd.f32 %v4772_v38, %v2406_v50  ;;  %v2066_v5 = vpop.f32.mrb[133].mxu1 }
 0x234   : > { %2126 = vst [vmem:[%s4827_s30 + $0x8] sm:$0xff] %v1972_v30  ;;  %v2683_v32 = vadd.f32 %v1751_v26, %v1077_v8  ;;  %v1753_v60 = vpop.f32.mrb[5].mxu0  ;;  %v2067_v41 = vadd.f32 %v4765_v18, %v2066_v5 }
 0x235   : > { %2146 = vst [vmem:[%s4827_s30 + $0xa8] sm:$0xff] %v2072_v48 }
 0x236   : > { %v1977_v40 = vadd.f32 %v2683_v32, %v4797_v47  ;;  %2145 = vst [vmem:[%s4827_s30 + $0xa0] sm:$0xff] %v2067_v41  ;;  %v2409_v55 = vpop.f32.mrb[134].mxu1 }
 0x237   : > { %v1756_v35 = vpop.f32.mrb[6].mxu0  ;;  %v2082_v38 = vadd.f32 %v4786_v1, %v2409_v55  ;;  %v2076_v27 = vpop.f32.mrb[135].mxu1 }
 0x238   : > { %2127 = vst [vmem:[%s4827_s30 + $0x10] sm:$0xff] %v1977_v40  ;;  %v2685_v19 = vadd.f32 %v1756_v35, %v1082_v37  ;;  %v1758_v49 = vpop.f32.mrb[7].mxu0  ;;  %v2077_v18 = vadd.f32 %v4779_v4, %v2076_v27 }
 0x239   : > { %2148 = vst [vmem:[%s4827_s30 + $0xb8] sm:$0xff] %v2082_v38 }
 0x23a   : > { %v1982_v47 = vadd.f32 %v2685_v19, %v4792_v63  ;;  %2147 = vst [vmem:[%s4827_s30 + $0xb0] sm:$0xff] %v2077_v18  ;;  %v2412_v10 = vpop.f32.mrb[136].mxu1 }
 0x23b   : > { %v1761_v58 = vpop.f32.mrb[8].mxu0  ;;  %v2092_v1 = vadd.f32 %v4804_v23, %v2412_v10  ;;  %v2086_v42 = vpop.f32.mrb[137].mxu1 }
 0x23c   : > { %2128 = vst [vmem:[%s4827_s30 + $0x18] sm:$0xff] %v1982_v47  ;;  %v2687_v12 = vadd.f32 %v1761_v58, %v1087_v56  ;;  %v1763_v36 = vpop.f32.mrb[9].mxu0  ;;  %v2087_v4 = vadd.f32 %v4795_v3, %v2086_v42 }
 0x23d   : > { %2150 = vst [vmem:[%s4827_s30 + $0xc8] sm:$0xff] %v2092_v1 }
 0x23e   : > { %v1987_v63 = vadd.f32 %v2687_v12, %v4806_v22  ;;  %2149 = vst [vmem:[%s4827_s30 + $0xc0] sm:$0xff] %v2087_v4  ;;  %v2415_v7 = vpop.f32.mrb[138].mxu1 }
 0x23f   : > { %v1766_v20 = vpop.f32.mrb[10].mxu0  ;;  %v2102_v23 = vadd.f32 %v4823_v53, %v2415_v7  ;;  %v2096_v9 = vpop.f32.mrb[139].mxu1 }
 0x240   : > { %2129 = vst [vmem:[%s4827_s30 + $0x20] sm:$0xff] %v1987_v63  ;;  %v2689_v51 = vadd.f32 %v1766_v20, %v1092_v44  ;;  %v1768_v45 = vpop.f32.mrb[11].mxu0  ;;  %v2097_v3 = vadd.f32 %v4814_v34, %v2096_v9 }
 0x241   : > { %2152 = vst [vmem:[%s4827_s30 + $0xd8] sm:$0xff] %v2102_v23 }
 0x242   : > { %v1992_v22 = vadd.f32 %v2689_v51, %v4801_v14  ;;  %2151 = vst [vmem:[%s4827_s30 + $0xd0] sm:$0xff] %v2097_v3  ;;  %v2418_v33 = vpop.f32.mrb[140].mxu1 }
 0x243   : > { %v1771_v11 = vpop.f32.mrb[12].mxu0  ;;  %v2112_v53 = vadd.f32 %v4843_v46, %v2418_v33  ;;  %v2106_v52 = vpop.f32.mrb[141].mxu1 }
 0x244   : > { %2130 = vst [vmem:[%s4827_s30 + $0x28] sm:$0xff] %v1992_v22  ;;  %v2691_v13 = vadd.f32 %v1771_v11, %v1097_v31  ;;  %v1773_v62 = vpop.f32.mrb[13].mxu0  ;;  %v2107_v34 = vadd.f32 %v4834_v59, %v2106_v52 }
 0x245   : > { %2154 = vst [vmem:[%s4827_s30 + $0xe8] sm:$0xff] %v2112_v53 }
 0x246   : > { %v1997_v14 = vadd.f32 %v2691_v13, %v4816_v2  ;;  %2153 = vst [vmem:[%s4827_s30 + $0xe0] sm:$0xff] %v2107_v34  ;;  %v2421_v29 = vpop.f32.mrb[142].mxu1 }
 0x247   : > { %v1776_v46 = vpop.f32.mrb[14].mxu0  ;;  %v2122_v25 = vadd.f32 %v4861_v0, %v2421_v29  ;;  %v2116_v28 = vpop.f32.mrb[143].mxu1 }
 0x248   : > { %2131 = vst [vmem:[%s4827_s30 + $0x30] sm:$0xff] %v1997_v14  ;;  %v2693_v59 = vadd.f32 %v1776_v46, %v1102_v16  ;;  %v1778_v39 = vpop.f32.mrb[15].mxu0  ;;  %v2117_v61 = vadd.f32 %v4852_v17, %v2116_v28 }
 0x249   : > { %2156 = vst [vmem:[%s4827_s30 + $0xf8] sm:$0xff] %v2122_v25 }
 0x24a   : > { %v2002_v21 = vadd.f32 %v2693_v59, %v4811_v6  ;;  %2155 = vst [vmem:[%s4827_s30 + $0xf0] sm:$0xff] %v2117_v61 }
 0x24c   : > { %2132 = vst [vmem:[%s4827_s30 + $0x38] sm:$0xff] %v2002_v21 }
 0x24d   : > { %2905 = shalt.err (!%p2902_p3)
}
 0x24e   : > { %s2906_s14 = scalar_lea.hbm %s4927_s11, 4096  ;;  %s2910_s23 = scalar_lea.hbm %s4982_s5, 8192 }
 0x24f   : > { %p2907_p4 = scmp.ne.s32.totalorder %s4927_s11, %s2906_s14  ;;  %p2911_p9 = scmp.lt.u32.totalorder %s4927_s11, %s4982_s5 }
 0x250   : > { %p2912_p10 = scmp.lt.u32.totalorder %s2910_s23, %s2906_s14  ;;  %p2914_p12 = scmp.lt.u32.totalorder %s2906_s14, %s4927_s11 }
 0x251   : > { %p2908_p7 = pnand %p2907_p4, %p3029_p5 }
 0x252   : > { %p2913_p11 = por %p2912_p10, %p2911_p9 }
 0x253   : > { %p2909_p8 = pneg %p2908_p7 }
 0x254   : > { %p2915_p13 = por %p2914_p12, %p2913_p11 }
 0x256   : > { %p2916_p0 = pnand %p2915_p13, %p2909_p8 }
 0x258   : > { %2919 = shalt.err (!%p2916_p0)
}
 0x259   : > { %s2959_s30 = smov 128   ;;  %s2960_s6 = smov 8  }
 0x25a   : > { %2847 = dma.vmem_to_hbm [thread:$0]  (%p3029_p5), %s4929_s7, 4096, %s4927_s11, %s4936_s22, %s2959_s30, %s2959_s30, %s2960_s6  }
 0x25b PF: > { %p2853_p1 = scmp.ge.s32.totalorder %s2954_s21, 2  ;;  %s2186_s8 = sand.u32 1, %s2942_s18  }
 0x25c   : > { %s2187_s10 = scalar_lea.sflag [#allocation3], %s2186_s8 }
 0x25d   : > { %p2850_p2 = pnand %p2853_p1, %p3033_p6 }
 0x25f   : > { %2937 = dma.done.wait (!%p2850_p2), %s2187_s10, 4096  }
 0x260   : > { %2939 = vsyncadd (!%p2850_p2), %s2187_s10, 4294963200  ;;  %p15_p3 = scmp.ge.s32.totalorder %s3016_s24, 4   ;;  %s5199_s18 = smov %s2946_s19 }
 0x261   : > { %s5200_s19 = smov %s2950_s20  ;;  %s5201_s20 = smov %s3027_s27 }
 0x262   : > { %s5202_s21 = smov %s3016_s24  ;;  %17 = sbr.rel (!%p15_p3) target bundleno = 3 (0x3), region = 75 }
 0x269   :  { %2192 = vsyncpa [#allocation3], 1 }
 0x26a   :  { %2194 = vsyncpa [#allocation3 + $0x1], 1 }

</bundles_post_ra>
